<compile_context>
chip_gen: v7x
topology: tpu7x:2x2x1
jax: 0.10.0
libtpu: 0.0.40
codegen_flags: <defaults>
</compile_context>

<pallas_src>
import functools

import jax
import jax.numpy as jnp
from jax.experimental import pallas as pl
from jax.experimental.pallas import tpu as pltpu

_LANE = 128


def _device_kind() -> str:
    try:
        return jax.devices()[0].device_kind.lower()
    except Exception:  # pragma: no cover
        return ""


def _is_v5e(kind: str) -> bool:
    return ("v5 lite" in kind) or ("v5e" in kind) or ("v5litepod" in kind)


def _num_tensorcores(kind: str) -> int:
    # v7x exposes two TensorCores per chip; a "parallel" grid axis with >= 2
    # steps lets Pallas shard the batch across them.  v5e / v6e have one TC.
    return 2 if ("v7" in kind or "tpu7" in kind) else 1


def _default_compute_dtype():
    # bf16 VPU/MXU math on v6e / v7x (native bf16 VALU), f32 on v5e.
    return jnp.float32 if _is_v5e(_device_kind()) else jnp.bfloat16


def qmix_kernel(xT_ref, w1_ref, b1_ref, w2_ref, b2_ref, w3_ref, b3_ref, o_ref,
                *, fc1_on_mxu):
    """One batch tile; activations are feature-major: (features, TB)."""
    xT = xT_ref[...]            # (A, TB)  compute dtype
    w1 = w1_ref[...]            # (H, A)   compute dtype
    num_agents = w1.shape[1]

    if fc1_on_mxu:
        # Larger agent counts: one small-K MXU pass beats the unrolled VPU
        # chain (MXU has slack on v6e/v7x).
        h1 = jnp.dot(w1, xT, preferred_element_type=jnp.float32)
    else:
        # fc1 on the VPU: K == num_agents is tiny, an MXU pass would use only a
        # handful of systolic rows.  Static unroll over agents.
        h1 = w1[:, 0:1] * xT[0:1, :]
        for a in range(1, num_agents):
            h1 = h1 + w1[:, a:a + 1] * xT[a:a + 1, :]
    h1 = jnp.maximum(h1 + b1_ref[...], 0).astype(w2_ref.dtype)       # (H, TB)

    # fc2: the only large matmul.  PyTorch (out, in) weight layout -> W2 @ h1.
    h2 = jnp.dot(w2_ref[...], h1,
                 preferred_element_type=jnp.float32) + b2_ref[...]
    h2 = jnp.maximum(h2, 0.0)                                         # (H, TB) f32

    # fc3: single output feature -> multiply by the w3 column and reduce over
    # the feature (sublane) axis; result is already lane-major (1, TB).
    out = jnp.sum(h2 * w3_ref[...], axis=0, keepdims=True) + b3_ref[0, 0]
    o_ref[...] = out.astype(o_ref.dtype)


@functools.partial(jax.jit,
                   static_argnames=("block_b", "compute_dtype", "fc1_on_mxu"))
def qmix_forward(q_values, w1, b1, w2, b2, w3, b3, *, block_b=2048,
                 compute_dtype=None, fc1_on_mxu=None):
    """q_values: (B, num_agents) f32 -> (B, 1) f32.

    Weights are in PyTorch nn.Linear layout: w (out_features, in_features),
    b (out_features,).
    """
    B, A = q_values.shape
    H = w1.shape[0]

    kind = _device_kind()
    if compute_dtype is None:
        compute_dtype = jnp.float32 if _is_v5e(kind) else jnp.bfloat16
    if fc1_on_mxu is None:
        fc1_on_mxu = (A >= 8) and not _is_v5e(kind)
    cd = compute_dtype

    # ---- batch tiling -------------------------------------------------------
    # Large tiles amortize the per-step grid overhead; balanced tiling caps
    # dead padded rows; on v7x force >= 2 tiles so both TensorCores are used.
    block_b = max(_LANE, (int(block_b) + _LANE - 1) // _LANE * _LANE)
    num_tiles = pl.cdiv(B, block_b)
    n_tc = _num_tensorcores(kind)
    if n_tc > 1:
        num_tiles = max(num_tiles, min(n_tc, pl.cdiv(B, _LANE)))
    TB = pl.cdiv(pl.cdiv(B, num_tiles), _LANE) * _LANE    # lane-aligned tile
    num_tiles = pl.cdiv(B, TB)
    Bp = num_tiles * TB

    # ---- operand layout (batch on the lane axis, weights resident) ----------
    xT = jnp.pad(q_values.astype(cd).T, ((0, 0), (0, Bp - B)))   # (A, Bp)
    w1_c = w1.astype(cd)                                         # (H, A)
    b1_c = b1.reshape(H, 1).astype(cd)                           # (H, 1)
    w2_c = w2.astype(cd)                                         # (H, H)
    b2_c = b2.reshape(H, 1).astype(jnp.float32)                  # (H, 1)
    w3_c = w3.reshape(H, 1).astype(jnp.float32)                  # (H, 1)
    b3_c = b3.reshape(1, 1).astype(jnp.float32)                  # SMEM scalar

    out = pl.pallas_call(
        functools.partial(qmix_kernel, fc1_on_mxu=bool(fc1_on_mxu)),
        out_shape=jax.ShapeDtypeStruct((1, Bp), jnp.float32),
        grid=(num_tiles,),
        in_specs=[
            pl.BlockSpec((A, TB), lambda i: (0, i)),    # x^T: tiled over batch
            pl.BlockSpec((H, A), lambda i: (0, 0)),     # w1: resident
            pl.BlockSpec((H, 1), lambda i: (0, 0)),     # b1: resident
            pl.BlockSpec((H, H), lambda i: (0, 0)),     # w2: resident
            pl.BlockSpec((H, 1), lambda i: (0, 0)),     # b2: resident
            pl.BlockSpec((H, 1), lambda i: (0, 0)),     # w3 column: resident
            pl.BlockSpec(memory_space=pltpu.MemorySpace.SMEM),   # b3 scalar
        ],
        out_specs=pl.BlockSpec((1, TB), lambda i: (0, i)),       # lane-dense
        compiler_params=pltpu.CompilerParams(
            dimension_semantics=("parallel",),
            vmem_limit_bytes=32 * 1024 * 1024,
        ),
    )(xT, w1_c, b1_c, w2_c, b2_c, w3_c, b3_c)

    return out[0, :B].reshape(B, 1)


def init_params(key, num_agents, hidden=256):
    """nn.Linear default init, PyTorch layout: w (out, in), b (out,)."""
    ks = jax.random.split(key, 6)

    def lin(kw, kb, fan_in, fan_out):
        bound = 1.0 / (fan_in ** 0.5)
        w = jax.random.uniform(kw, (fan_out, fan_in), jnp.float32, -bound, bound)
        b = jax.random.uniform(kb, (fan_out,), jnp.float32, -bound, bound)
        return w, b

    w1, b1 = lin(ks[0], ks[1], num_agents, hidden)
    w2, b2 = lin(ks[2], ks[3], hidden, hidden)
    w3, b3 = lin(ks[4], ks[5], hidden, 1)
    return w1, b1, w2, b2, w3, b3


def qmix_reference(q_values, w1, b1, w2, b2, w3, b3, compute_dtype=jnp.float32):
    """Pure-JAX reference with the same per-layer input dtypes / f32 accum."""
    cd = compute_dtype
    x = q_values.astype(cd)
    h1 = jnp.maximum(
        jnp.dot(x, w1.T.astype(cd), preferred_element_type=jnp.float32) + b1, 0.0
    ).astype(cd)
    h2 = jnp.maximum(
        jnp.dot(h1, w2.T.astype(cd), preferred_element_type=jnp.float32) + b2, 0.0
    )
    return jnp.dot(h2, w3.T) + b3


if __name__ == "__main__":
    key = jax.random.PRNGKey(0)
    k_p1, k_x1, k_p2, k_x2 = jax.random.split(key, 4)
    cd = _default_compute_dtype()

    # Case 1: few agents -> VPU fc1 path, single grid step.
    num_agents, batch = 4, 8
    params = init_params(k_p1, num_agents)
    q = jax.random.normal(k_x1, (batch, num_agents), dtype=jnp.float32)
    out = jax.block_until_ready(qmix_forward(q, *params))
    ref = qmix_reference(q, *params, compute_dtype=cd)
    assert out.shape == (batch, 1), out.shape
    assert jnp.allclose(out, ref, atol=5e-2, rtol=5e-2), (out, ref)

    # Case 2: more agents + odd batch + small block_b -> multi-tile grid,
    # padding, and (on v6e/v7x) the MXU fc1 path.
    num_agents2, batch2 = 16, 300
    params2 = init_params(k_p2, num_agents2)
    q2 = jax.random.normal(k_x2, (batch2, num_agents2), dtype=jnp.float32)
    out2 = jax.block_until_ready(qmix_forward(q2, *params2, block_b=128))
    ref2 = qmix_reference(q2, *params2, compute_dtype=cd)
    assert out2.shape == (batch2, 1), out2.shape
    assert jnp.allclose(out2, ref2, atol=5e-2, rtol=5e-2), (out2, ref2)

    print("KERNEL_OK")
</pallas_src>

<mosaic_0001>
module attributes {stable_mosaic.version = 11 : i64} {
  func.func @qmix_kernel(%arg0: i32, %arg1: memref<4x128xbf16, #tpu.memory_space<vmem>>, %arg2: memref<256x4xbf16, #tpu.memory_space<vmem>>, %arg3: memref<256x1xbf16, #tpu.memory_space<vmem>>, %arg4: memref<256x256xbf16, #tpu.memory_space<vmem>>, %arg5: memref<256x1xf32, #tpu.memory_space<vmem>>, %arg6: memref<256x1xf32, #tpu.memory_space<vmem>>, %arg7: memref<1x1xf32, #tpu.memory_space<smem>>, %arg8: memref<1x128xf32, #tpu.memory_space<vmem>>) attributes {dimension_semantics = [#tpu.dimension_semantics<parallel>], iteration_bounds = array<i64: 1>, scalar_prefetch = 0 : i64, scratch_operands = 0 : i64, tpu.core_type = #tpu.core_type<tc>, window_params = [{transform_indices = @transform_0, window_bounds = array<i64: 4, 128>}, {pipeline_mode = #tpu.pipeline_mode<synchronous>, transform_indices = @transform_1, window_bounds = array<i64: 256, 4>}, {pipeline_mode = #tpu.pipeline_mode<synchronous>, transform_indices = @transform_2, window_bounds = array<i64: 256, 1>}, {pipeline_mode = #tpu.pipeline_mode<synchronous>, transform_indices = @transform_3, window_bounds = array<i64: 256, 256>}, {pipeline_mode = #tpu.pipeline_mode<synchronous>, transform_indices = @transform_4, window_bounds = array<i64: 256, 1>}, {pipeline_mode = #tpu.pipeline_mode<synchronous>, transform_indices = @transform_5, window_bounds = array<i64: 256, 1>}, {transform_indices = @transform_6, window_bounds = array<i64: 1, 1>}, {transform_indices = @transform_7, window_bounds = array<i64: 1, 128>}]} {
    %c0 = arith.constant 0 : index
    %c0_0 = arith.constant 0 : index
    %0 = vector.load %arg1[%c0, %c0_0] : memref<4x128xbf16, #tpu.memory_space<vmem>>, vector<4x128xbf16>
    %c0_1 = arith.constant 0 : index
    %c0_2 = arith.constant 0 : index
    %1 = vector.load %arg2[%c0_1, %c0_2] : memref<256x4xbf16, #tpu.memory_space<vmem>>, vector<256x4xbf16>
    %2 = vector.extract_strided_slice %1 {offsets = [0, 0], sizes = [256, 1], strides = [1, 1]} : vector<256x4xbf16> to vector<256x1xbf16>
    %3 = vector.extract_strided_slice %0 {offsets = [0, 0], sizes = [1, 128], strides = [1, 1]} : vector<4x128xbf16> to vector<1x128xbf16>
    %4 = vector.broadcast %2 : vector<256x1xbf16> to vector<256x128xbf16>
    %5 = vector.broadcast %3 : vector<1x128xbf16> to vector<256x128xbf16>
    %6 = arith.mulf %4, %5 : vector<256x128xbf16>
    %7 = vector.extract_strided_slice %1 {offsets = [0, 1], sizes = [256, 1], strides = [1, 1]} : vector<256x4xbf16> to vector<256x1xbf16>
    %8 = vector.extract_strided_slice %0 {offsets = [1, 0], sizes = [1, 128], strides = [1, 1]} : vector<4x128xbf16> to vector<1x128xbf16>
    %9 = vector.broadcast %7 : vector<256x1xbf16> to vector<256x128xbf16>
    %10 = vector.broadcast %8 : vector<1x128xbf16> to vector<256x128xbf16>
    %11 = arith.mulf %9, %10 : vector<256x128xbf16>
    %12 = arith.addf %6, %11 : vector<256x128xbf16>
    %13 = vector.extract_strided_slice %1 {offsets = [0, 2], sizes = [256, 1], strides = [1, 1]} : vector<256x4xbf16> to vector<256x1xbf16>
    %14 = vector.extract_strided_slice %0 {offsets = [2, 0], sizes = [1, 128], strides = [1, 1]} : vector<4x128xbf16> to vector<1x128xbf16>
    %15 = vector.broadcast %13 : vector<256x1xbf16> to vector<256x128xbf16>
    %16 = vector.broadcast %14 : vector<1x128xbf16> to vector<256x128xbf16>
    %17 = arith.mulf %15, %16 : vector<256x128xbf16>
    %18 = arith.addf %12, %17 : vector<256x128xbf16>
    %19 = vector.extract_strided_slice %1 {offsets = [0, 3], sizes = [256, 1], strides = [1, 1]} : vector<256x4xbf16> to vector<256x1xbf16>
    %20 = vector.extract_strided_slice %0 {offsets = [3, 0], sizes = [1, 128], strides = [1, 1]} : vector<4x128xbf16> to vector<1x128xbf16>
    %21 = vector.broadcast %19 : vector<256x1xbf16> to vector<256x128xbf16>
    %22 = vector.broadcast %20 : vector<1x128xbf16> to vector<256x128xbf16>
    %23 = arith.mulf %21, %22 : vector<256x128xbf16>
    %24 = arith.addf %18, %23 : vector<256x128xbf16>
    %c0_3 = arith.constant 0 : index
    %c0_4 = arith.constant 0 : index
    %25 = vector.load %arg3[%c0_3, %c0_4] : memref<256x1xbf16, #tpu.memory_space<vmem>>, vector<256x1xbf16>
    %26 = vector.broadcast %25 : vector<256x1xbf16> to vector<256x128xbf16>
    %27 = arith.addf %24, %26 : vector<256x128xbf16>
    %cst = arith.constant 0.000000e+00 : bf16
    %28 = vector.broadcast %cst : bf16 to vector<256x128xbf16>
    %29 = arith.maximumf %27, %28 : vector<256x128xbf16>
    %c0_5 = arith.constant 0 : index
    %c0_6 = arith.constant 0 : index
    %30 = vector.load %arg4[%c0_5, %c0_6] : memref<256x256xbf16, #tpu.memory_space<vmem>>, vector<256x256xbf16>
    %cst_7 = arith.constant dense<0.000000e+00> : vector<256x128xf32>
    %31 = tpu.matmul %30, %29, %cst_7 {dimension_numbers = #tpu.dot_dimension_numbers<[1], [0], [0], [1], [0, 0, 1, 1], [], []>} : vector<256x256xbf16>, vector<256x128xbf16>, vector<256x128xf32> -> vector<256x128xf32>
    %c0_8 = arith.constant 0 : index
    %c0_9 = arith.constant 0 : index
    %32 = vector.load %arg5[%c0_8, %c0_9] : memref<256x1xf32, #tpu.memory_space<vmem>>, vector<256x1xf32>
    %33 = vector.broadcast %32 : vector<256x1xf32> to vector<256x128xf32>
    %34 = arith.addf %31, %33 : vector<256x128xf32>
    %cst_10 = arith.constant 0.000000e+00 : f32
    %35 = vector.broadcast %cst_10 : f32 to vector<256x128xf32>
    %36 = arith.maximumf %34, %35 : vector<256x128xf32>
    %c0_11 = arith.constant 0 : index
    %c0_12 = arith.constant 0 : index
    %37 = vector.load %arg6[%c0_11, %c0_12] : memref<256x1xf32, #tpu.memory_space<vmem>>, vector<256x1xf32>
    %38 = vector.broadcast %37 : vector<256x1xf32> to vector<256x128xf32>
    %39 = arith.mulf %36, %38 : vector<256x128xf32>
    %cst_13 = arith.constant dense<0.000000e+00> : vector<128xf32>
    %40 = vector.multi_reduction <add>, %39, %cst_13 [0] : vector<256x128xf32> to vector<128xf32>
    %41 = vector.shape_cast %40 : vector<128xf32> to vector<1x128xf32>
    %c0_14 = arith.constant 0 : index
    %c0_15 = arith.constant 0 : index
    %42 = memref.load %arg7[%c0_14, %c0_15] : memref<1x1xf32, #tpu.memory_space<smem>>
    %43 = vector.broadcast %42 : f32 to vector<1x128xf32>
    %44 = arith.addf %41, %43 : vector<1x128xf32>
    %c0_16 = arith.constant 0 : index
    %c0_17 = arith.constant 0 : index
    %45 = vector.load %arg8[%c0_16, %c0_17] : memref<1x128xf32, #tpu.memory_space<vmem>>, vector<1x128xf32>
    tpu.vector_store %arg8[%c0_16, %c0_17], %44 {strides = array<i32>} : memref<1x128xf32, #tpu.memory_space<vmem>>, vector<1x128xf32>,
    return
  }
  func.func @transform_0(%arg0: i32) -> (i32, i32) {
    %c0_i32 = arith.constant 0 : i32
    %c0_i32_0 = arith.constant 0 : i32
    return %c0_i32, %arg0 : i32, i32
  }
  func.func @transform_1(%arg0: i32) -> (i32, i32) {
    %c0_i32 = arith.constant 0 : i32
    %c0_i32_0 = arith.constant 0 : i32
    %c0_i32_1 = arith.constant 0 : i32
    return %c0_i32, %c0_i32_0 : i32, i32
  }
  func.func @transform_2(%arg0: i32) -> (i32, i32) {
    %c0_i32 = arith.constant 0 : i32
    %c0_i32_0 = arith.constant 0 : i32
    %c0_i32_1 = arith.constant 0 : i32
    return %c0_i32, %c0_i32_0 : i32, i32
  }
  func.func @transform_3(%arg0: i32) -> (i32, i32) {
    %c0_i32 = arith.constant 0 : i32
    %c0_i32_0 = arith.constant 0 : i32
    %c0_i32_1 = arith.constant 0 : i32
    return %c0_i32, %c0_i32_0 : i32, i32
  }
  func.func @transform_4(%arg0: i32) -> (i32, i32) {
    %c0_i32 = arith.constant 0 : i32
    %c0_i32_0 = arith.constant 0 : i32
    %c0_i32_1 = arith.constant 0 : i32
    return %c0_i32, %c0_i32_0 : i32, i32
  }
  func.func @transform_5(%arg0: i32) -> (i32, i32) {
    %c0_i32 = arith.constant 0 : i32
    %c0_i32_0 = arith.constant 0 : i32
    %c0_i32_1 = arith.constant 0 : i32
    return %c0_i32, %c0_i32_0 : i32, i32
  }
  func.func @transform_6(%arg0: i32) -> (i32, i32) {
    %c0_i32 = arith.constant 0 : i32
    %c0_i32_0 = arith.constant 0 : i32
    %c0_i32_1 = arith.constant 0 : i32
    return %c0_i32, %c0_i32_0 : i32, i32
  }
  func.func @transform_7(%arg0: i32) -> (i32, i32) {
    %c0_i32 = arith.constant 0 : i32
    %c0_i32_0 = arith.constant 0 : i32
    return %c0_i32, %arg0 : i32, i32
  }
}

</mosaic_0001>

<bundles_post_ra>
// kernel: qmix_forward.1
= control target key start
LH: loop header
LB: loop body
LE: loop exit
PB: predicated region body
PF: predicated region fallthrough
CT: control target
= control target key end

     0   :  { %v3439_v0 = vmov 1   ;;  %v5152_v1 = vmov 0   ;;  %v3441_v20 = vmov 2   ;;  %v5150_v35 = vmov 3   ;;  %s5142_s1 = inlined_call_operand.vmem [shape: bf16[256,4], index: 1, kind: input, shape index: {}]   ;;  %s5143_s2 = inlined_call_operand.vmem [shape: bf16[256,1], index: 2, kind: input, shape index: {}]   ;;  %s5144_s4 = inlined_call_operand.vmem [shape: f32[256,1], index: 4, kind: input, shape index: {}]   ;;  %s5145_s0 = inlined_call_operand.vmem [shape: bf16[4,128], index: 0, kind: input, shape index: {}]   ;;  %s5146_s5 = inlined_call_operand.vmem [shape: f32[256,1], index: 5, kind: input, shape index: {}]   ;;  %s5147_s3 = inlined_call_operand.vmem [shape: bf16[256,256], index: 3, kind: input, shape index: {}]   ;;  %s5148_s6 = inlined_call_operand.<no memory space> [shape: f32[1,1], index: 6, kind: input, shape index: {}]   ;;  %s5149_s7 = inlined_call_operand.vmem [shape: f32[1,128], index: 7, kind: output, shape index: {}]  }
   0x1   :  { %3371 = vset.pattern.permute.xlu0 %v3439_v0  ;;  %3370 = vset.pattern.permute.xlu1 %v5152_v1  ;;  %v3488_v2 = vld [vmem:[%s5142_s1 + $0x8] sm:$0xf]  ;;  %v3493_v3 = vld [vmem:[%s5142_s1] sm:$0xf]  ;;  %v3500_v4 = vld [vmem:[%s5142_s1 + $0xc] sm:$0xf] }
   0x2   :  { %87 = vperm.xlu1 %3370, %v3488_v2   ;;  %489 = vperm.xlu0 %3371, %v3493_v3   ;;  %v3507_v5 = vld [vmem:[%s5142_s1 + $0x14] sm:$0xf]  ;;  %v3514_v6 = vld [vmem:[%s5142_s1 + $0x1c] sm:$0xf]  ;;  %v3521_v7 = vld [vmem:[%s5142_s1 + $0x24] sm:$0xf] }
   0x3   :  { %v3528_v8 = vld [vmem:[%s5142_s1 + $0x2c] sm:$0xf]  ;;  %v3535_v9 = vld [vmem:[%s5142_s1 + $0x34] sm:$0xf]  ;;  %v3542_v10 = vld [vmem:[%s5142_s1 + $0x3c] sm:$0xf] }
   0x4   :  { %v3549_v11 = vld [vmem:[%s5142_s1 + $0x44] sm:$0xf]  ;;  %v3556_v12 = vld [vmem:[%s5142_s1 + $0x4c] sm:$0xf]  ;;  %v3563_v13 = vld [vmem:[%s5142_s1 + $0x54] sm:$0xf] }
   0x5   :  { %v3570_v14 = vld [vmem:[%s5142_s1 + $0x5c] sm:$0xf]  ;;  %v3577_v15 = vld [vmem:[%s5142_s1 + $0x64] sm:$0xf]  ;;  %v3584_v16 = vld [vmem:[%s5142_s1 + $0x6c] sm:$0xf] }
   0x6   :  { %99 = vperm.xlu1 %3370, %v3500_v4   ;;  %522 = vperm.xlu0 %3371, %v3500_v4   ;;  %v3591_v17 = vld [vmem:[%s5142_s1 + $0x74] sm:$0xf]  ;;  %v3598_v18 = vld [vmem:[%s5142_s1 + $0x7c] sm:$0xf]  ;;  %v3605_v19 = vld [vmem:[%s5142_s1 + $0x4] sm:$0xf] }
   0x7   :  { %v3612_v21 = vld [vmem:[%s5142_s1 + $0x10] sm:$0xf]  ;;  %v3619_v22 = vld [vmem:[%s5142_s1 + $0x18] sm:$0xf]  ;;  %v3626_v23 = vld [vmem:[%s5142_s1 + $0x20] sm:$0xf] }
   0x8   :  { %v3633_v24 = vld [vmem:[%s5142_s1 + $0x28] sm:$0xf]  ;;  %v3640_v25 = vld [vmem:[%s5142_s1 + $0x30] sm:$0xf]  ;;  %v3647_v26 = vld [vmem:[%s5142_s1 + $0x38] sm:$0xf] }
   0x9   :  { %v3654_v27 = vld [vmem:[%s5142_s1 + $0x40] sm:$0xf]  ;;  %v3661_v28 = vld [vmem:[%s5142_s1 + $0x48] sm:$0xf]  ;;  %v3668_v29 = vld [vmem:[%s5142_s1 + $0x50] sm:$0xf] }
   0xa   :  { %123 = vperm.xlu1 %3370, %v3507_v5   ;;  %544 = vperm.xlu0 %3371, %v3507_v5   ;;  %v3675_v30 = vld [vmem:[%s5142_s1 + $0x58] sm:$0xf]  ;;  %v3682_v31 = vld [vmem:[%s5142_s1 + $0x60] sm:$0xf]  ;;  %v3689_v32 = vld [vmem:[%s5142_s1 + $0x68] sm:$0xf] }
   0xb   :  { %v3696_v33 = vld [vmem:[%s5142_s1 + $0x70] sm:$0xf]  ;;  %v3703_v34 = vld [vmem:[%s5142_s1 + $0x78] sm:$0xf] }
   0xe   :  { %147 = vperm.xlu1 %3370, %v3514_v6   ;;  %566 = vperm.xlu0 %3371, %v3514_v6  }
  0x12   :  { %171 = vperm.xlu1 %3370, %v3521_v7   ;;  %588 = vperm.xlu0 %3371, %v3521_v7  }
  0x16   :  { %195 = vperm.xlu1 %3370, %v3528_v8   ;;  %610 = vperm.xlu0 %3371, %v3528_v8  }
  0x1a   :  { %219 = vperm.xlu1 %3370, %v3535_v9   ;;  %632 = vperm.xlu0 %3371, %v3535_v9  }
  0x1e   :  { %243 = vperm.xlu1 %3370, %v3542_v10   ;;  %654 = vperm.xlu0 %3371, %v3542_v10  }
  0x22   :  { %267 = vperm.xlu1 %3370, %v3549_v11   ;;  %676 = vperm.xlu0 %3371, %v3549_v11  }
  0x26   :  { %291 = vperm.xlu1 %3370, %v3556_v12   ;;  %698 = vperm.xlu0 %3371, %v3556_v12  }
  0x2a   :  { %315 = vperm.xlu1 %3370, %v3563_v13   ;;  %720 = vperm.xlu0 %3371, %v3563_v13  }
  0x2e   :  { %339 = vperm.xlu1 %3370, %v3570_v14   ;;  %742 = vperm.xlu0 %3371, %v3570_v14  }
  0x32   :  { %363 = vperm.xlu1 %3370, %v3577_v15   ;;  %764 = vperm.xlu0 %3371, %v3577_v15  }
  0x36   :  { %387 = vperm.xlu1 %3370, %v3584_v16   ;;  %786 = vperm.xlu0 %3371, %v3584_v16  }
  0x3a   :  { %411 = vperm.xlu1 %3370, %v3591_v17   ;;  %808 = vperm.xlu0 %3371, %v3591_v17  }
  0x3e   :  { %435 = vperm.xlu1 %3370, %v3598_v18   ;;  %830 = vperm.xlu0 %3371, %v3598_v18  }
  0x42   :  { %3372 = vset.pattern.permute.xlu1 %v3439_v0  ;;  %3374 = vset.pattern.permute.xlu0 %v3441_v20 }
  0x43   :  { %500 = vperm.xlu1 %3372, %v3605_v19   ;;  %927 = vperm.xlu0 %3374, %v3605_v19  }
  0x47   :  { %511 = vperm.xlu1 %3372, %v3488_v2   ;;  %960 = vperm.xlu0 %3374, %v3612_v21  }
  0x4b   :  { %533 = vperm.xlu1 %3372, %v3612_v21   ;;  %982 = vperm.xlu0 %3374, %v3619_v22  }
  0x4f   :  { %555 = vperm.xlu1 %3372, %v3619_v22   ;;  %1004 = vperm.xlu0 %3374, %v3626_v23  }
  0x53   :  { %577 = vperm.xlu1 %3372, %v3626_v23   ;;  %1026 = vperm.xlu0 %3374, %v3633_v24  }
  0x57   :  { %599 = vperm.xlu1 %3372, %v3633_v24   ;;  %1048 = vperm.xlu0 %3374, %v3640_v25  }
  0x5b   :  { %621 = vperm.xlu1 %3372, %v3640_v25   ;;  %1070 = vperm.xlu0 %3374, %v3647_v26  }
  0x5f   :  { %643 = vperm.xlu1 %3372, %v3647_v26   ;;  %1092 = vperm.xlu0 %3374, %v3654_v27  }
  0x63   :  { %665 = vperm.xlu1 %3372, %v3654_v27   ;;  %1114 = vperm.xlu0 %3374, %v3661_v28  }
  0x67   :  { %687 = vperm.xlu1 %3372, %v3661_v28   ;;  %1136 = vperm.xlu0 %3374, %v3668_v29  }
  0x6b   :  { %709 = vperm.xlu1 %3372, %v3668_v29   ;;  %1158 = vperm.xlu0 %3374, %v3675_v30  }
  0x6f   :  { %731 = vperm.xlu1 %3372, %v3675_v30   ;;  %1180 = vperm.xlu0 %3374, %v3682_v31  }
  0x73   :  { %753 = vperm.xlu1 %3372, %v3682_v31   ;;  %1202 = vperm.xlu0 %3374, %v3689_v32  }
  0x77   :  { %775 = vperm.xlu1 %3372, %v3689_v32   ;;  %1224 = vperm.xlu0 %3374, %v3696_v33  }
  0x7b   :  { %797 = vperm.xlu1 %3372, %v3696_v33   ;;  %1246 = vperm.xlu0 %3374, %v3703_v34  }
  0x7f   :  { %819 = vperm.xlu1 %3372, %v3703_v34   ;;  %3375 = vset.pattern.permute.xlu0 %v5150_v35 }
  0x80   :  { %1340 = vperm.xlu0 %3375, %v3493_v3  }
  0x81   :  { %v3710_v36 = vpop.permute.xlu1 %87  ;;  %v3712_v37 = vpop.permute.xlu0 %489 }
  0x83   :  { %3373 = vset.pattern.permute.xlu1 %v3441_v20 }
  0x84   :  { %916 = vperm.xlu1 %3373, %v3493_v3   ;;  %1373 = vperm.xlu0 %3375, %v3500_v4  }
  0x85   :  { %v3716_v38 = vpop.permute.xlu1 %99  ;;  %v3718_v39 = vpop.permute.xlu0 %522 }
  0x88   :  { %938 = vperm.xlu1 %3373, %v3488_v2   ;;  %1395 = vperm.xlu0 %3375, %v3507_v5  }
  0x89   :  { %v3722_v40 = vpop.permute.xlu1 %123  ;;  %v3724_v41 = vpop.permute.xlu0 %544 }
  0x8c   :  { %949 = vperm.xlu1 %3373, %v3500_v4   ;;  %1417 = vperm.xlu0 %3375, %v3514_v6  }
  0x8d   :  { %v3728_v42 = vpop.permute.xlu1 %147  ;;  %v3730_v43 = vpop.permute.xlu0 %566 }
  0x8e   :  { %5154 = vst [vmem:[#allocation3_spill] sm:$0xff] %v3728_v42  ;;  %5155 = vst [vmem:[#allocation4_spill] sm:$0xff] %v3730_v43 }
  0x90   :  { %971 = vperm.xlu1 %3373, %v3507_v5   ;;  %1439 = vperm.xlu0 %3375, %v3521_v7  }
  0x91   :  { %v3734_v44 = vpop.permute.xlu1 %171  ;;  %v3736_v45 = vpop.permute.xlu0 %588 }
  0x92   :  { %5156 = vst [vmem:[#allocation5_spill] sm:$0xff] %v3734_v44  ;;  %5157 = vst [vmem:[#allocation6_spill] sm:$0xff] %v3736_v45  ;;  %v2285_v45 = vld [vmem:[%s5144_s4 + $0x50] sm:$0xff] }
  0x93   :  { %v2289_v44 = vld [vmem:[%s5144_s4 + $0x70] sm:$0xff] }
  0x94   :  { %993 = vperm.xlu1 %3373, %v3514_v6   ;;  %1461 = vperm.xlu0 %3375, %v3528_v8  }
  0x95   :  { %v3740_v46 = vpop.permute.xlu1 %195  ;;  %v3742_v47 = vpop.permute.xlu0 %610 }
  0x96   :  { %5158 = vst [vmem:[#allocation7_spill] sm:$0xff] %v3740_v46  ;;  %5159 = vst [vmem:[#allocation8_spill] sm:$0xff] %v3742_v47  ;;  %v1790_v47 = vld [vmem:[%s5143_s2 + $0x6c] sm:$0xf] }
  0x98   :  { %1015 = vperm.xlu1 %3373, %v3521_v7   ;;  %1483 = vperm.xlu0 %3375, %v3535_v9  }
  0x99   :  { %v3746_v48 = vpop.permute.xlu1 %219  ;;  %v3748_v49 = vpop.permute.xlu0 %632 }
  0x9a   :  { %5160 = vst [vmem:[#allocation9_spill] sm:$0xff] %v3746_v48  ;;  %5161 = vst [vmem:[#allocation10_spill] sm:$0xff] %v3748_v49  ;;  %v1788_v48 = vld [vmem:[%s5143_s2 + $0x64] sm:$0xf] }
  0x9c   :  { %1037 = vperm.xlu1 %3373, %v3528_v8   ;;  %1505 = vperm.xlu0 %3375, %v3542_v10  }
  0x9d   :  { %v3752_v50 = vpop.permute.xlu1 %243  ;;  %v3754_v51 = vpop.permute.xlu0 %654 }
  0x9e   :  { %5162 = vst [vmem:[#allocation11_spill] sm:$0xff] %v3752_v50  ;;  %5163 = vst [vmem:[#allocation12_spill] sm:$0xff] %v3754_v51 }
  0xa0   :  { %1059 = vperm.xlu1 %3373, %v3535_v9   ;;  %1527 = vperm.xlu0 %3375, %v3549_v11  }
  0xa1   :  { %v3758_v52 = vpop.permute.xlu1 %267  ;;  %v3760_v53 = vpop.permute.xlu0 %676 }
  0xa4   :  { %1081 = vperm.xlu1 %3373, %v3542_v10   ;;  %1549 = vperm.xlu0 %3375, %v3556_v12  }
  0xa5   :  { %v3764_v54 = vpop.permute.xlu1 %291  ;;  %v3766_v55 = vpop.permute.xlu0 %698 }
  0xa8   :  { %1103 = vperm.xlu1 %3373, %v3549_v11   ;;  %1560 = vperm.xlu0 %3375, %v3668_v29  }
  0xa9   :  { %v3770_v56 = vpop.permute.xlu1 %315  ;;  %v3772_v57 = vpop.permute.xlu0 %720 }
  0xac   :  { %1125 = vperm.xlu1 %3373, %v3556_v12   ;;  %1582 = vperm.xlu0 %3375, %v3675_v30  }
  0xad   :  { %v3776_v58 = vpop.permute.xlu1 %339  ;;  %v3778_v59 = vpop.permute.xlu0 %742 }
  0xae   :  { %5164 = vst [vmem:[#allocation13_spill] sm:$0xff] %v3776_v58  ;;  %5165 = vst [vmem:[#allocation14_spill] sm:$0xff] %v3778_v59 }
  0xb0   :  { %1147 = vperm.xlu1 %3373, %v3563_v13   ;;  %1604 = vperm.xlu0 %3375, %v3682_v31  }
  0xb1   :  { %v3782_v60 = vpop.permute.xlu1 %363  ;;  %v3784_v61 = vpop.permute.xlu0 %764 }
  0xb2   :  { %5166 = vst [vmem:[#allocation15_spill] sm:$0xff] %v3782_v60  ;;  %5167 = vst [vmem:[#allocation16_spill] sm:$0xff] %v3784_v61 }
  0xb4   :  { %1169 = vperm.xlu1 %3373, %v3570_v14   ;;  %1626 = vperm.xlu0 %3375, %v3689_v32  }
  0xb5   :  { %v3788_v62 = vpop.permute.xlu1 %387  ;;  %v3790_v63 = vpop.permute.xlu0 %786 }
  0xb6   :  { %5168 = vst [vmem:[#allocation17_spill] sm:$0xff] %v3788_v62  ;;  %5169 = vst [vmem:[#allocation18_spill] sm:$0xff] %v3790_v63  ;;  %v1768_v63 = vld [vmem:[%s5143_s2 + $0x14] sm:$0xf] }
  0xb8   :  { %1191 = vperm.xlu1 %3373, %v3577_v15   ;;  %1648 = vperm.xlu0 %3375, %v3696_v33  }
  0xb9   :  { %v3794_v0 = vpop.permute.xlu1 %411  ;;  %v3796_v4 = vpop.permute.xlu0 %808 }
  0xba   :  { %5170 = vst [vmem:[#allocation19_spill] sm:$0xff] %v3794_v0  ;;  %5171 = vst [vmem:[#allocation20_spill] sm:$0xff] %v3796_v4  ;;  %v1779_v4 = vld [vmem:[%s5143_s2 + $0x40] sm:$0xf]  ;;  %v5187_v0 = vmov 0  }
  0xbc   :  { %1213 = vperm.xlu1 %3373, %v3584_v16   ;;  %1670 = vperm.xlu0 %3375, %v3703_v34  }
  0xbd   :  { %v3800_v5 = vpop.permute.xlu1 %435  ;;  %v3802_v6 = vpop.permute.xlu0 %830 }
  0xbe   :  { %5172 = vst [vmem:[#allocation21_spill] sm:$0xff] %v3800_v5  ;;  %5173 = vst [vmem:[#allocation22_spill] sm:$0xff] %v3802_v6 }
  0xc0   :  { %1235 = vperm.xlu1 %3373, %v3591_v17   ;;  %3388 = vset.pattern.permute.xlu0 %v5152_v1 }
  0xc1   :  { %63 = vperm.xlu0 %3388, %v3493_v3  }
  0xc2   :  { %v3807_v7 = vpop.permute.xlu1 %500  ;;  %v3809_v8 = vpop.permute.xlu0 %927 }
  0xc4   :  { %1257 = vperm.xlu1 %3373, %v3598_v18  }
  0xc5   :  { %75 = vperm.xlu0 %3388, %v3605_v19  }
  0xc6   :  { %v3813_v9 = vpop.permute.xlu1 %511  ;;  %v3815_v10 = vpop.permute.xlu0 %960 }
  0xc8   :  { %3376 = vset.pattern.permute.xlu1 %v5150_v35 }
  0xc9   :  { %1351 = vperm.xlu1 %3376, %v3605_v19   ;;  %111 = vperm.xlu0 %3388, %v3612_v21  }
  0xca   :  { %v3820_v11 = vpop.permute.xlu1 %533  ;;  %v3822_v3 = vpop.permute.xlu0 %982 }
  0xcb   :  { %5174 = vst [vmem:[#allocation23_spill] sm:$0xff] %v3822_v3 }
  0xcd   :  { %1362 = vperm.xlu1 %3376, %v3488_v2   ;;  %135 = vperm.xlu0 %3388, %v3619_v22  }
  0xce   :  { %v3826_v12 = vpop.permute.xlu1 %555  ;;  %v3828_v20 = vpop.permute.xlu0 %1004 }
  0xcf   :  { %5175 = vst [vmem:[#allocation24_spill] sm:$0xff] %v3826_v12  ;;  %5176 = vst [vmem:[#allocation25_spill] sm:$0xff] %v3828_v20  ;;  %v1770_v20 = vld [vmem:[%s5143_s2 + $0x1c] sm:$0xf] }
  0xd1   :  { %1384 = vperm.xlu1 %3376, %v3612_v21   ;;  %159 = vperm.xlu0 %3388, %v3626_v23  }
  0xd2   :  { %v3832_v35 = vpop.permute.xlu1 %577  ;;  %v3834_v19 = vpop.permute.xlu0 %1026 }
  0xd3   :  { %5177 = vst [vmem:[#allocation26_spill] sm:$0xff] %v3832_v35  ;;  %5178 = vst [vmem:[#allocation27_spill] sm:$0xff] %v3834_v19  ;;  %v2283_v35 = vld [vmem:[%s5144_s4 + $0x40] sm:$0xff] }
  0xd5   :  { %1406 = vperm.xlu1 %3376, %v3619_v22   ;;  %183 = vperm.xlu0 %3388, %v3633_v24  }
  0xd6   :  { %v3838_v1 = vpop.permute.xlu1 %599  ;;  %v3840_v2 = vpop.permute.xlu0 %1048 }
  0xd7   :  { %5179 = vst [vmem:[#allocation28_spill] sm:$0xff] %v3838_v1  ;;  %5180 = vst [vmem:[#allocation29_spill] sm:$0xff] %v3840_v2  ;;  %v1766_v1 = vld [vmem:[%s5143_s2 + $0xc] sm:$0xf] }
  0xd9   :  { %1428 = vperm.xlu1 %3376, %v3626_v23   ;;  %207 = vperm.xlu0 %3388, %v3640_v25  }
  0xda   :  { %v3844_v6 = vpop.permute.xlu1 %621  ;;  %v3846_v21 = vpop.permute.xlu0 %1070 }
  0xdb   :  { %5181 = vst [vmem:[#allocation30_spill] sm:$0xff] %v3844_v6  ;;  %5182 = vst [vmem:[#allocation31_spill] sm:$0xff] %v3846_v21 }
  0xdd   :  { %1450 = vperm.xlu1 %3376, %v3633_v24   ;;  %231 = vperm.xlu0 %3388, %v3647_v26  }
  0xde   :  { %v3850_v5 = vpop.permute.xlu1 %643  ;;  %v3852_v22 = vpop.permute.xlu0 %1092 }
  0xdf   :  { %5183 = vst [vmem:[#allocation32_spill] sm:$0xff] %v3850_v5 }
  0xe1   :  { %1472 = vperm.xlu1 %3376, %v3640_v25   ;;  %255 = vperm.xlu0 %3388, %v3654_v27  }
  0xe2   :  { %v3856_v2 = vpop.permute.xlu1 %665  ;;  %v3858_v23 = vpop.permute.xlu0 %1114 }
  0xe5   :  { %1494 = vperm.xlu1 %3376, %v3647_v26   ;;  %279 = vperm.xlu0 %3388, %v3661_v28  }
  0xe6   :  { %v3862_v21 = vpop.permute.xlu1 %687  ;;  %v3864_v24 = vpop.permute.xlu0 %1136 }
  0xe9   :  { %1516 = vperm.xlu1 %3376, %v3654_v27   ;;  %303 = vperm.xlu0 %3388, %v3668_v29  }
  0xea   :  { %v3868_v5 = vpop.permute.xlu1 %709  ;;  %v3870_v25 = vpop.permute.xlu0 %1158 }
  0xeb   :  { %5184 = vst [vmem:[#allocation33_spill] sm:$0xff] %v3870_v25 }
  0xed   :  { %1538 = vperm.xlu1 %3376, %v3661_v28   ;;  %327 = vperm.xlu0 %3388, %v3675_v30   ;;  %v1763_v28 = vld [vmem:[%s5143_s2] sm:$0xf] }
  0xee   :  { %v3874_v6 = vpop.permute.xlu1 %731  ;;  %v3876_v26 = vpop.permute.xlu0 %1180 }
  0xef   :  { %5185 = vst [vmem:[#allocation34_spill] sm:$0xff] %v3874_v6  ;;  %5186 = vst [vmem:[#allocation35_spill] sm:$0xff] %v3876_v26 }
  0xf1   :  { %3377 = vset.pattern.permute.xlu1 %v5187_v0  ;;  %351 = vperm.xlu0 %3388, %v3682_v31   ;;  %v1764_v31 = vld [vmem:[%s5143_s2 + $0x4] sm:$0xf] }
  0xf2   :  { %v3883_v27 = vpop.permute.xlu1 %753  ;;  %1989 = vperm.xlu1 %3377, %v1779_v4   ;;  %v3885_v29 = vpop.permute.xlu0 %1202 }
  0xf3   :  { %5188 = vst [vmem:[#allocation36_spill] sm:$0xff] %v3883_v27  ;;  %5189 = vst [vmem:[#allocation37_spill] sm:$0xff] %v3885_v29 }
  0xf5   :  { %375 = vperm.xlu0 %3388, %v3689_v32   ;;  %v5195_v32 = vmov 3  }
  0xf6   :  { %v3891_v30 = vpop.permute.xlu1 %775  ;;  %1797 = vperm.xlu1 %3377, %v1763_v28   ;;  %v3893_v51 = vpop.permute.xlu0 %1224  ;;  %v1780_v28 = vld [vmem:[%s5143_s2 + $0x44] sm:$0xf] }
  0xf7   :  { %5190 = vst [vmem:[#allocation38_spill] sm:$0xff] %v3891_v30  ;;  %5191 = vst [vmem:[#allocation39_spill] sm:$0xff] %v3893_v51  ;;  %v1793_v30 = vld [vmem:[%s5143_s2 + $0x78] sm:$0xf] }
  0xf9   :  { %399 = vperm.xlu0 %3388, %v3696_v33   ;;  %v1781_v33 = vld [vmem:[%s5143_s2 + $0x48] sm:$0xf] }
  0xfa   :  { %v3899_v4 = vpop.permute.xlu1 %797  ;;  %1809 = vperm.xlu1 %3377, %v1764_v31   ;;  %v3901_v50 = vpop.permute.xlu0 %1246 }
  0xfb   :  { %5192 = vst [vmem:[#allocation40_spill] sm:$0xff] %v3899_v4  ;;  %5193 = vst [vmem:[#allocation41_spill] sm:$0xff] %v3901_v50 }
  0xfd   :  { %423 = vperm.xlu0 %3388, %v3703_v34   ;;  %v1782_v34 = vld [vmem:[%s5143_s2 + $0x4c] sm:$0xf] }
  0xfe   :  { %v3904_v19 = vpop.permute.xlu1 %819  ;;  %3378 = vset.pattern.permute.xlu1 %v5195_v32 }
  0xff   :  { %5194 = vst [vmem:[#allocation42_spill] sm:$0xff] %v3904_v19  ;;  %1571 = vperm.xlu1 %3378, %v3563_v13   ;;  %v3911_v51 = vpop.permute.xlu0 %1340  ;;  %v1765_v13 = vld [vmem:[%s5143_s2 + $0x8] sm:$0xf] }
 0x101   :  { %2001 = vperm.xlu0 %3388, %v1780_v28   ;;  %v1784_v28 = vld [vmem:[%s5143_s2 + $0x54] sm:$0xf] }
 0x103   :  { %3379 = vset.pattern.permute.xlu1 %v5187_v0  ;;  %v3920_v31 = vpop.permute.xlu1 %916  ;;  %v3922_v50 = vpop.permute.xlu0 %1373 }
 0x104   :  { %2013 = vperm.xlu1 %3379, %v1781_v33   ;;  %v1786_v33 = vld [vmem:[%s5143_s2 + $0x5c] sm:$0xf] }
 0x105   :  { %2025 = vperm.xlu0 %3388, %v1782_v34  }
 0x107   :  { %v3930_v19 = vpop.permute.xlu1 %938  ;;  %v3932_v4 = vpop.permute.xlu0 %1395 }
 0x108   :  { %5196 = vst [vmem:[#allocation43_spill] sm:$0xff] %v3932_v4  ;;  %1821 = vperm.xlu1 %3379, %v1765_v13  }
 0x109   :  { %2049 = vperm.xlu0 %3388, %v1784_v28  }
 0x10b   :  { %v3940_v34 = vpop.permute.xlu1 %949  ;;  %v3942_v49 = vpop.permute.xlu0 %1417 }
 0x10c   :  { %5197 = vst [vmem:[#allocation44_spill] sm:$0xff] %v3942_v49  ;;  %1833 = vperm.xlu1 %3379, %v1766_v1  }
 0x10d   :  { %2073 = vperm.xlu0 %3388, %v1786_v33   ;;  %v1783_v33 = vld [vmem:[%s5143_s2 + $0x50] sm:$0xf] }
 0x10f   :  { %v3947_v13 = vpop.permute.xlu1 %971  ;;  %v3949_v28 = vpop.permute.xlu0 %1439 }
 0x110   :  { %5198 = vst [vmem:[#allocation45_spill] sm:$0xff] %v3949_v28  ;;  %3380 = vset.pattern.permute.xlu1 %v5195_v32 }
 0x111   :  { %1593 = vperm.xlu1 %3380, %v3570_v14   ;;  %2097 = vperm.xlu0 %3388, %v1788_v48   ;;  %v1792_v14 = vld [vmem:[%s5143_s2 + $0x74] sm:$0xf] }
 0x113   :  { %v3956_v29 = vpop.permute.xlu1 %993  ;;  %v3958_v1 = vpop.permute.xlu0 %1461 }
 0x114   :  { %5199 = vst [vmem:[#allocation46_spill] sm:$0xff] %v3956_v29  ;;  %5200 = vst [vmem:[#allocation47_spill] sm:$0xff] %v3958_v1  ;;  %v1767_v1 = vld [vmem:[%s5143_s2 + $0x10] sm:$0xf] }
 0x115   :  { %3381 = vset.pattern.permute.xlu1 %v5187_v0  ;;  %2121 = vperm.xlu0 %3388, %v1790_v47  }
 0x116   :  { %2037 = vperm.xlu1 %3381, %v1783_v33  }
 0x117   :  { %v3967_v48 = vpop.permute.xlu1 %1015  ;;  %v3969_v46 = vpop.permute.xlu0 %1483 }
 0x118   :  { %5201 = vst [vmem:[#allocation48_spill] sm:$0xff] %v3967_v48  ;;  %5202 = vst [vmem:[#allocation49_spill] sm:$0xff] %v3969_v46  ;;  %v1777_v46 = vld [vmem:[%s5143_s2 + $0x38] sm:$0xf] }
 0x119   :  { %2145 = vperm.xlu0 %3388, %v1792_v14  }
 0x11a   :  { %1845 = vperm.xlu1 %3381, %v1767_v1  }
 0x11b   :  { %v3977_v47 = vpop.permute.xlu1 %1037  ;;  %v3979_v33 = vpop.permute.xlu0 %1505 }
 0x11c   :  { %5203 = vst [vmem:[#allocation50_spill] sm:$0xff] %v3977_v47  ;;  %5204 = vst [vmem:[#allocation51_spill] sm:$0xff] %v3979_v33  ;;  %v2275_v33 = vld [vmem:[%s5144_s4] sm:$0xff] }
 0x11d   :  { %2157 = vperm.xlu0 %3388, %v1793_v30   ;;  %v1785_v30 = vld [vmem:[%s5143_s2 + $0x58] sm:$0xf] }
 0x11e   :  { %1857 = vperm.xlu1 %3381, %v1768_v63  }
 0x11f   :  { %v3987_v14 = vpop.permute.xlu1 %1059  ;;  %v3989_v1 = vpop.permute.xlu0 %1527 }
 0x120   :  { %5205 = vst [vmem:[#allocation52_spill] sm:$0xff] %v3987_v14 }
 0x121   :  { %1965 = vperm.xlu0 %3388, %v1777_v46   ;;  %v2277_v46 = vld [vmem:[%s5144_s4 + $0x10] sm:$0xff] }
 0x122   :  { %3382 = vset.pattern.permute.xlu1 %v5195_v32 }
 0x123   :  { %1615 = vperm.xlu1 %3382, %v3577_v15   ;;  %v3996_v47 = vpop.permute.xlu1 %1081  ;;  %v3998_v63 = vpop.permute.xlu0 %1549  ;;  %v1769_v15 = vld [vmem:[%s5143_s2 + $0x18] sm:$0xf] }
 0x124   :  { %5206 = vst [vmem:[#allocation53_spill] sm:$0xff] %v3996_v47 }
 0x125   :  { %2309 = vperm.xlu0 %3388, %v2275_v33   ;;  %v2279_v33 = vld [vmem:[%s5144_s4 + $0x20] sm:$0xff] }
 0x127   :  { %3383 = vset.pattern.permute.xlu1 %v5187_v0  ;;  %v4007_v14 = vpop.permute.xlu1 %1103  ;;  %v4009_v62 = vpop.permute.xlu0 %1560 }
 0x128   :  { %2061 = vperm.xlu1 %3383, %v1785_v30   ;;  %v2281_v30 = vld [vmem:[%s5144_s4 + $0x30] sm:$0xff] }
 0x129   :  { %2319 = vperm.xlu0 %3388, %v2277_v46  }
 0x12b   :  { %v4017_v47 = vpop.permute.xlu1 %1125  ;;  %v4019_v28 = vpop.permute.xlu0 %1582 }
 0x12c   :  { %5207 = vst [vmem:[#allocation54_spill] sm:$0xff] %v4019_v28  ;;  %1869 = vperm.xlu1 %3383, %v1769_v15  }
 0x12d   :  { %2329 = vperm.xlu0 %3388, %v2279_v33  }
 0x12f   :  { %v4027_v46 = vpop.permute.xlu1 %1147  ;;  %v4029_v48 = vpop.permute.xlu0 %1604 }
 0x130   :  { %5208 = vst [vmem:[#allocation55_spill] sm:$0xff] %v4029_v48  ;;  %1881 = vperm.xlu1 %3383, %v1770_v20  }
 0x131   :  { %2339 = vperm.xlu0 %3388, %v2281_v30   ;;  %v1787_v30 = vld [vmem:[%s5143_s2 + $0x60] sm:$0xf] }
 0x133   :  { %v4034_v15 = vpop.permute.xlu1 %1169  ;;  %v4036_v33 = vpop.permute.xlu0 %1626 }
 0x134   :  { %5209 = vst [vmem:[#allocation56_spill] sm:$0xff] %v4034_v15  ;;  %5210 = vst [vmem:[#allocation57_spill] sm:$0xff] %v4036_v33  ;;  %3384 = vset.pattern.permute.xlu1 %v5195_v32 }
 0x135   :  { %1637 = vperm.xlu1 %3384, %v3584_v16   ;;  %2349 = vperm.xlu0 %3388, %v2283_v35   ;;  %v2287_v16 = vld [vmem:[%s5144_s4 + $0x60] sm:$0xff] }
 0x137   :  { %v4043_v48 = vpop.permute.xlu1 %1191  ;;  %v4045_v20 = vpop.permute.xlu0 %1648 }
 0x138   :  { %5211 = vst [vmem:[#allocation58_spill] sm:$0xff] %v4043_v48  ;;  %5212 = vst [vmem:[#allocation59_spill] sm:$0xff] %v4045_v20  ;;  %v1771_v20 = vld [vmem:[%s5143_s2 + $0x20] sm:$0xf] }
 0x139   :  { %3385 = vset.pattern.permute.xlu1 %v5187_v0  ;;  %2359 = vperm.xlu0 %3388, %v2285_v45  }
 0x13a   :  { %2085 = vperm.xlu1 %3385, %v1787_v30   ;;  %v1772_v30 = vld [vmem:[%s5143_s2 + $0x24] sm:$0xf] }
 0x13b   :  { %v4054_v35 = vpop.permute.xlu1 %1213  ;;  %v4056_v33 = vpop.permute.xlu0 %1670 }
 0x13c   :  { %5213 = vst [vmem:[#allocation60_spill] sm:$0xff] %v4054_v35  ;;  %5214 = vst [vmem:[#allocation61_spill] sm:$0xff] %v4056_v33  ;;  %v2291_v33 = vld [vmem:[%s5144_s4 + $0x80] sm:$0xff] }
 0x13d   :  { %2369 = vperm.xlu0 %3388, %v2287_v16  }
 0x13e   :  { %1893 = vperm.xlu1 %3385, %v1771_v20  }
 0x13f   :  { %v4064_v45 = vpop.permute.xlu1 %1235 }
 0x140   :  { %5215 = vst [vmem:[#allocation62_spill] sm:$0xff] %v4064_v45  ;;  %v4069_v26 = vpop.permute.xlu0 %63  ;;  %v2293_v45 = vld [vmem:[%s5144_s4 + $0x90] sm:$0xff] }
 0x141   :  { %2379 = vperm.xlu0 %3388, %v2289_v44  }
 0x142   :  { %1905 = vperm.xlu1 %3385, %v1772_v30   ;;  %v1789_v30 = vld [vmem:[%s5143_s2 + $0x68] sm:$0xf] }
 0x143   :  { %v4074_v16 = vpop.permute.xlu1 %1257 }
 0x144   :  { %5216 = vst [vmem:[#allocation63_spill] sm:$0xff] %v4074_v16  ;;  %v4076_v20 = vpop.permute.xlu0 %75 }
 0x145   :  { %2389 = vperm.xlu0 %3388, %v2291_v33   ;;  %v2295_v33 = vld [vmem:[%s5144_s4 + $0xa0] sm:$0xff] }
 0x146   :  { %3386 = vset.pattern.permute.xlu1 %v5195_v32 }
 0x147   :  { %1659 = vperm.xlu1 %3386, %v3591_v17   ;;  %v1773_v17 = vld [vmem:[%s5143_s2 + $0x28] sm:$0xf] }
 0x148   :  { %v4083_v35 = vpop.permute.xlu1 %1351  ;;  %v4085_v44 = vpop.permute.xlu0 %111 }
 0x149   :  { %2399 = vperm.xlu0 %3388, %v2293_v45   ;;  %v2297_v45 = vld [vmem:[%s5144_s4 + $0xb0] sm:$0xff] }
 0x14b   :  { %3387 = vset.pattern.permute.xlu1 %v5187_v0 }
 0x14c   :  { %2109 = vperm.xlu1 %3387, %v1789_v30   ;;  %v4094_v16 = vpop.permute.xlu1 %1362  ;;  %v4096_v48 = vpop.permute.xlu0 %135  ;;  %v1774_v30 = vld [vmem:[%s5143_s2 + $0x2c] sm:$0xf] }
 0x14d   :  { %5217 = vst [vmem:[#allocation64_spill] sm:$0xff] %v4096_v48  ;;  %2409 = vperm.xlu0 %3388, %v2295_v33   ;;  %v2299_v33 = vld [vmem:[%s5144_s4 + $0xc0] sm:$0xff] }
 0x150   :  { %1917 = vperm.xlu1 %3387, %v1773_v17   ;;  %v4104_v27 = vpop.permute.xlu1 %1384  ;;  %v4106_v61 = vpop.permute.xlu0 %159  ;;  %v2301_v17 = vld [vmem:[%s5144_s4 + $0xd0] sm:$0xff] }
 0x151   :  { %5218 = vst [vmem:[#allocation65_spill] sm:$0xff] %v4104_v27  ;;  %5219 = vst [vmem:[#allocation66_spill] sm:$0xff] %v4106_v61  ;;  %2419 = vperm.xlu0 %3388, %v2297_v45  }
 0x154   :  { %1929 = vperm.xlu1 %3387, %v1774_v30   ;;  %v4114_v60 = vpop.permute.xlu1 %1406  ;;  %v4116_v49 = vpop.permute.xlu0 %183  ;;  %v2303_v30 = vld [vmem:[%s5144_s4 + $0xe0] sm:$0xff] }
 0x155   :  { %5220 = vst [vmem:[#allocation67_spill] sm:$0xff] %v4114_v60  ;;  %5221 = vst [vmem:[#allocation68_spill] sm:$0xff] %v4116_v49  ;;  %2429 = vperm.xlu0 %3388, %v2299_v33   ;;  %v1791_v33 = vld [vmem:[%s5143_s2 + $0x70] sm:$0xf]  ;;  %v69_v49 = vlaneseq }
 0x158   :  { %3389 = vset.pattern.permute.xlu1 %v5195_v32  ;;  %v4122_v45 = vpop.permute.xlu1 %1428  ;;  %v4124_v61 = vpop.permute.xlu0 %207  ;;  %v28_v32 = vld [vmem:[%s5145_s0] sm:$0x3] }
 0x159   :  { %5222 = vst [vmem:[#allocation69_spill] sm:$0xff] %v4122_v45  ;;  %5223 = vst [vmem:[#allocation70_spill] sm:$0xff] %v4124_v61  ;;  %1681 = vperm.xlu1 %3389, %v3598_v18   ;;  %2439 = vperm.xlu0 %3388, %v2301_v17   ;;  %v840_v18 = vshrl.u32 %v28_v32, 16  ;;  %v2917_v17 = vld [vmem:[%s5146_s5 + $0x8] sm:$0xff]  ;;  %v1775_v61 = vld [vmem:[%s5143_s2 + $0x30] sm:$0xf]  ;;  %v446_v48 = vpack.i.b16 %v28_v32, %v28_v32 }
 0x15b   :  { %v841_v12 = vpack.i.b16 %v840_v18, %v840_v18  ;;  %v1794_v18 = vld [vmem:[%s5143_s2 + $0x7c] sm:$0xf] }
 0x15c   :  { %v4133_v60 = vpop.permute.xlu1 %1450  ;;  %v4135_v3 = vpop.permute.xlu0 %231 }
 0x15d   :  { %5224 = vst [vmem:[#allocation71_spill] sm:$0xff] %v4133_v60  ;;  %5225 = vst [vmem:[#allocation72_spill] sm:$0xff] %v4135_v3  ;;  %3390 = vset.pattern.permute.xlu1 %v5187_v0  ;;  %2449 = vperm.xlu0 %3388, %v2303_v30   ;;  %v3443_v60 = vmov 839922192   ;;  %v70_v3 = vshrl.u32 %v69_v49, 7  ;;  %v2919_v30 = vld [vmem:[%s5146_s5 + $0x18] sm:$0xff] }
 0x15e   :  { %2133 = vperm.xlu1 %3390, %v1791_v33   ;;  %v67_v45 = vunpack.c.l.s4 %v3443_v60  ;;  %v1776_v33 = vld [vmem:[%s5143_s2 + $0x34] sm:$0xf] }
 0x15f   :  { %v450_v42 = vsub.s32 0, %v70_v3  ;;  %v1269_v25 = vsub.s32 1, %v70_v3 }
 0x160   :  { %v4147_v29 = vpop.permute.xlu1 %1472  ;;  %v4149_v28 = vpop.permute.xlu0 %255  ;;  %v68_v43 = vunpack.c.0.s8 %v67_v45 }
 0x161   :  { %5226 = vst [vmem:[#allocation73_spill] sm:$0xff] %v4147_v29  ;;  %2955 = vperm.xlu0 %3388, %v2917_v17   ;;  %v846_v29 = vrot.slane %v841_v12, %v450_v42  ;;  %v451_v45 = vrot.slane %v446_v48, %v450_v42  ;;  %v2923_v42 = vld [vmem:[%s5146_s5 + $0x38] sm:$0xff]  ;;  %v1694_v59 = vrot.slane %v841_v12, %v1269_v25 }
 0x162   :  { %1941 = vperm.xlu1 %3390, %v1775_v61   ;;  %v2921_v61 = vld [vmem:[%s5146_s5 + $0x28] sm:$0xff]  ;;  %v4167_v17 = vsub.s32 %v68_v43, %v70_v3 }
 0x164   :  { %v4157_v60 = vpop.permute.xlu1 %1494  ;;  %v4159_v49 = vpop.permute.xlu0 %279  ;;  %v531_v15 = vrot.slane %v3718_v39, %v4167_v17  ;;  %v276_v6 = vrot.slane %v3758_v52, %v4167_v17  ;;  %v685_v43 = vrot.slane %v3760_v53, %v4167_v17  ;;  %v300_v3 = vrot.slane %v3764_v54, %v4167_v17  ;;  %v1778_v39 = vld [vmem:[%s5143_s2 + $0x3c] sm:$0xf] }
 0x165   :  { %5227 = vst [vmem:[#allocation74_spill] sm:$0xff] %v4157_v60  ;;  %2965 = vperm.xlu0 %3388, %v2919_v30   ;;  %v4173_v30 = vcombine.low %v846_v29, %v846_v29  ;;  %v4193_v29 = vcombine.low %v451_v45, %v451_v45  ;;  %v1270_v52 = vrot.slane %v446_v48, %v1269_v25  ;;  %v2925_v45 = vld [vmem:[%s5146_s5 + $0x48] sm:$0xff] }
 0x166   :  { %1953 = vperm.xlu1 %3390, %v1776_v33   ;;  %v108_v33 = vrot.slane %v3716_v38, %v4167_v17  ;;  %v707_v38 = vrot.slane %v3766_v55, %v4167_v17  ;;  %v96_v53 = vrot.slane %v3710_v36, %v4167_v17  ;;  %v498_v54 = vrot.slane %v3712_v37, %v4167_v17 }
 0x167   :  { %v4207_v58 = vmul.bf16 %v4173_v30, %v531_v15  ;;  %v4210_v48 = vmul.bf16 %v4193_v29, %v276_v6  ;;  %v4216_v36 = vmul.bf16 %v4173_v30, %v685_v43  ;;  %v4219_v12 = vmul.bf16 %v4193_v29, %v300_v3  ;;  %v2276_v6 = vld [vmem:[%s5144_s4 + $0x8] sm:$0xff] }
 0x168   :  { %v4169_v32 = vpop.permute.xlu1 %1516  ;;  %v4171_v60 = vpop.permute.xlu0 %303  ;;  %v4204_v55 = vmul.bf16 %v4193_v29, %v108_v33  ;;  %v4222_v37 = vmul.bf16 %v4173_v30, %v707_v38  ;;  %v84_v25 = vrot.slane %v4076_v20, %v4167_v17  ;;  %v509_v15 = vrot.slane %v3807_v7, %v4167_v17 }
 0x169   :  { %2975 = vperm.xlu0 %3388, %v2921_v61   ;;  %v4231_v33 = vcombine.low %v1270_v52, %v1270_v52  ;;  %v936_v43 = vrot.slane %v3809_v8, %v4167_v17  ;;  %v4237_v3 = vcombine.low %v1694_v59, %v1694_v59  ;;  %v72_v38 = vrot.slane %v4069_v26, %v4167_v17  ;;  %v2927_v26 = vld [vmem:[%s5146_s5 + $0x58] sm:$0xff] }
 0x16a   :  { %2169 = vperm.xlu1 %3390, %v1794_v18   ;;  %v264_v20 = vrot.slane %v4149_v28, %v4167_v17  ;;  %v4246_v7 = vmul.bf16 %v4193_v29, %v96_v53  ;;  %v4249_v52 = vmul.bf16 %v4173_v30, %v498_v54  ;;  %v674_v59 = vrot.slane %v3856_v2, %v4167_v17  ;;  %v2278_v2 = vld [vmem:[%s5144_s4 + $0x18] sm:$0xff] }
 0x16b   :  { %v900_v28 = vadd.bf16 %v4216_v36, %v4210_v48  ;;  %v852_v8 = vmul.bf16 %v4173_v30, %v509_v15  ;;  %v1101_v48 = vrot.slane %v3852_v22, %v4167_v17  ;;  %v1112_v36 = vrot.slane %v4007_v14, %v4167_v17 }
 0x16c   :  { %v4195_v61 = vpop.permute.xlu1 %1538  ;;  %v4197_v18 = vpop.permute.xlu0 %327  ;;  %v1276_v54 = vmul.bf16 %v4231_v33, %v936_v43  ;;  %v867_v15 = vmul.bf16 %v4173_v30, %v674_v59  ;;  %v1349_v22 = vrot.slane %v3911_v51, %v4167_v17  ;;  %v925_v14 = vrot.slane %v3920_v31, %v4167_v17  ;;  %v2280_v31 = vld [vmem:[%s5144_s4 + $0x28] sm:$0xff] }
 0x16d   :  { %5228 = vst [vmem:[#allocation75_spill] sm:$0xff] %v4197_v18  ;;  %2985 = vperm.xlu0 %3388, %v2923_v42   ;;  %v472_v18 = vmul.bf16 %v4193_v29, %v264_v20  ;;  %v288_v43 = vrot.slane %v4159_v49, %v4167_v17  ;;  %v1360_v59 = vrot.slane %v4083_v35, %v4167_v17  ;;  %v2931_v35 = vld [vmem:[%s5146_s5 + $0x78] sm:$0xff] }
 0x16e   :  { %1977 = vperm.xlu1 %3390, %v1778_v39   ;;  %v1525_v51 = vrot.slane %v4169_v32, %v4167_v17  ;;  %v520_v49 = vrot.slane %v3813_v9, %v4167_v17  ;;  %v3393_v32 = vld [vmem:[%s5147_s3 + $0x4] ss:$8 sps:$4 sm:$0xff]   ;;  %v1123_v9 = vrot.slane %v3858_v23, %v4167_v17  ;;  %v1699_v4 = vmul.bf16 %v4237_v3, %v1349_v22 }
 0x16f   :  { %v1275_v27 = vmul.bf16 %v4231_v33, %v925_v14  ;;  %v474_v23 = vmul.bf16 %v4193_v29, %v288_v43  ;;  %2755 = vmatprep.mubr.bf16.mxu0 %v3393_v32  ;;  %v1547_v14 = vrot.slane %v4195_v61, %v4167_v17  ;;  %v947_v61 = vrot.slane %v3930_v19, %v4167_v17 }
 0x170   :  { %v4233_v42 = vpop.permute.xlu0 %351  ;;  %v5232_v19 = vadd.bf16 %v4222_v37, %v4219_v12  ;;  %v5233_v12 = vrot.slane %v3770_v56, %v4167_v17 }
 0x171   :  { %5229 = vst [vmem:[#allocation76_spill] sm:$0xff] %v4233_v42  ;;  %v4243_v39 = vpop.permute.xlu1 %1989  ;;  %2995 = vperm.xlu0 %3388, %v2925_v45   ;;  %v457_v45 = vmul.bf16 %v4193_v29, %v84_v25  ;;  %v696_v25 = vrot.slane %v3862_v21, %v4167_v17  ;;  %v456_v42 = vmul.bf16 %v4193_v29, %v72_v38  ;;  %v2929_v21 = vld [vmem:[%s5146_s5 + $0x68] sm:$0xff] }
 0x172   :  { %2314 = vperm.xlu1 %3390, %v2276_v6   ;;  %v1536_v38 = vrot.slane %v3989_v1, %v4167_v17  ;;  %v1134_v1 = vrot.slane %v4017_v47, %v4167_v17  ;;  %v2282_v47 = vld [vmem:[%s5144_s4 + $0x38] sm:$0xff]  ;;  %v4375_v37 = vmul.bf16 %v4193_v29, %v5233_v12 }
 0x173   :  { %v884_v20 = vadd.bf16 %v852_v8, %v457_v45  ;;  %v869_v45 = vmul.bf16 %v4173_v30, %v696_v25 }
 0x174   :  { %v4275_v53 = vpop.permute.xlu0 %375  ;;  %v1294_v22 = vmul.bf16 %v4231_v33, %v1134_v1 }
 0x175   :  { %5230 = vst [vmem:[#allocation77_spill] sm:$0xff] %v4275_v53  ;;  %v4282_v6 = vpop.permute.xlu1 %1797  ;;  %3005 = vperm.xlu0 %3388, %v2927_v26   ;;  %v1291_v26 = vmul.bf16 %v4231_v33, %v1101_v48  ;;  %v883_v48 = vadd.bf16 %v4249_v52, %v456_v42  ;;  %v1700_v42 = vmul.bf16 %v4237_v3, %v1360_v59 }
 0x176   :  { %2324 = vperm.xlu1 %3390, %v2278_v2   ;;  %v1292_v2 = vmul.bf16 %v4231_v33, %v1112_v36  ;;  %v899_v36 = vadd.bf16 %v867_v15, %v472_v18  ;;  %v1716_v18 = vmul.bf16 %v4237_v3, %v1536_v38  ;;  %v1715_v52 = vmul.bf16 %v4237_v3, %v1525_v51  ;;  %v2933_v38 = vld [vmem:[%s5146_s5 + $0x88] sm:$0xff] }
 0x177   :  { %v1308_v25 = vadd.bf16 %v1276_v54, %v884_v20  ;;  %v1558_v15 = vrot.slane %v3998_v63, %v4167_v17  ;;  %v1998_v54 = vrot.slane %v4243_v39, %v4167_v17  ;;  %v1307_v20 = vadd.bf16 %v1275_v27, %v883_v48 }
 0x178   :  { %v4309_v8 = vpop.permute.xlu0 %399  ;;  %v1323_v59 = vadd.bf16 %v1291_v26, %v899_v36  ;;  %v853_v63 = vmul.bf16 %v4173_v30, %v520_v49  ;;  %v958_v26 = vrot.slane %v3940_v34, %v4167_v17  ;;  %v1806_v27 = vrot.slane %v4282_v6, %v4167_v17  ;;  %v2935_v34 = vld [vmem:[%s5146_s5 + $0x98] sm:$0xff] }
 0x179   :  { %5231 = vst [vmem:[#allocation78_spill] sm:$0xff] %v4309_v8  ;;  %v1810_v53 = vpop.permute.xlu1 %1809  ;;  %3015 = vperm.xlu0 %3388, %v2929_v21   ;;  %v3396_v8 = vld [vmem:[%s5147_s3 + $0x84] ss:$8 sps:$4 sm:$0xff]   ;;  %v1324_v21 = vadd.bf16 %v1292_v2, %v900_v28  ;;  %v1293_v28 = vmul.bf16 %v4231_v33, %v1123_v9  ;;  %v1732_v39 = vadd.bf16 %v1700_v42, %v1308_v25 }
 0x17a   :  { %2334 = vperm.xlu1 %3390, %v2280_v31   ;;  %2819 = vmatprep.mubr.bf16.mxu1 %v3396_v8  ;;  %v1818_v51 = vrot.slane %v1810_v53, %v4167_v17  ;;  %v901_v31 = vadd.bf16 %v869_v45, %v474_v23  ;;  %v1747_v1 = vadd.bf16 %v1715_v52, %v1323_v59  ;;  %v2284_v53 = vld [vmem:[%s5144_s4 + $0x48] sm:$0xff] }
 0x17b   :  { %v1718_v49 = vmul.bf16 %v4237_v3, %v1558_v15  ;;  %v1326_v8 = vadd.bf16 %v1294_v22, %v5232_v19  ;;  %v1748_v9 = vadd.bf16 %v1716_v18, %v1324_v21  ;;  %v1731_v45 = vadd.bf16 %v1699_v4, %v1307_v20 }
 0x17c   :  { %v4338_v43 = vpop.permute.xlu0 %423  ;;  %v2195_v6 = vadd.bf16 %v1998_v54, %v1747_v1  ;;  %v2180_v48 = vadd.bf16 %v1818_v51, %v1732_v39  ;;  %v885_v23 = vadd.bf16 %v853_v63, %v4246_v7  ;;  %v1371_v18 = vrot.slane %v4094_v16, %v4167_v17 }
 0x17d   :  { %3025 = vperm.xlu0 %3388, %v2931_v35   ;;  %v1717_v35 = vmul.bf16 %v4237_v3, %v1547_v14  ;;  %v1325_v4 = vadd.bf16 %v1293_v28, %v901_v31  ;;  %v1382_v42 = vrot.slane %v3922_v50, %v4167_v17  ;;  %v1277_v52 = vmul.bf16 %v4231_v33, %v947_v61  ;;  %v2937_v61 = vld [vmem:[%s5146_s5 + $0xa8] sm:$0xff] }
 0x17e   :  { %2344 = vperm.xlu1 %3390, %v2282_v47   ;;  %v4350_v2 = vpop.permute.xlu1 %1571  ;;  %v2286_v47 = vld [vmem:[%s5144_s4 + $0x58] sm:$0xff]  ;;  %v2179_v25 = vadd.bf16 %v1806_v27, %v1731_v45  ;;  %v1278_v56 = vmul.bf16 %v4231_v33, %v958_v26  ;;  %v1750_v7 = vadd.bf16 %v1718_v49, %v1326_v8  ;;  %v2227_v16 = vmax.bf16 %v5187_v0, %v2195_v6 }
 0x17f   :  { %v1749_v22 = vadd.bf16 %v1717_v35, %v1325_v4  ;;  %v2212_v50 = vmax.bf16 %v5187_v0, %v2180_v48  ;;  %v718_v20 = vrot.slane %v3868_v5, %v4167_v17  ;;  %v1701_v51 = vmul.bf16 %v4237_v3, %v1371_v18  ;;  %v2288_v5 = vld [vmem:[%s5144_s4 + $0x68] sm:$0xff]  ;;  %v2939_v45 = vld [vmem:[%s5146_s5 + $0xb8] sm:$0xff] }
 0x180   :  { %v2002_v32 = vpop.permute.xlu0 %2001  ;;  %v312_v63 = vrot.slane %v4171_v60, %v4167_v17  ;;  %v1702_v31 = vmul.bf16 %v4237_v3, %v1382_v42  ;;  %v2211_v39 = vmax.bf16 %v5187_v0, %v2179_v25  ;;  %v5234_v60 = vadd.bf16 %v4207_v58, %v4204_v55 }
 0x181   :  { %v2010_v36 = vrot.slane %v2002_v32, %v4167_v17  ;;  %3035 = vperm.xlu0 %3388, %v2933_v38   ;;  %v1156_v35 = vrot.slane %v4027_v46, %v4167_v17  ;;  %v1145_v46 = vrot.slane %v3864_v24, %v4167_v17  ;;  %v871_v48 = vmul.bf16 %v4173_v30, %v718_v20 }
 0x182   :  { %2354 = vperm.xlu1 %3390, %v2284_v53   ;;  %v1309_v53 = vadd.bf16 %v1277_v52, %v885_v23  ;;  %v1310_v49 = vadd.bf16 %v1278_v56, %v5234_v60  ;;  %v476_v58 = vmul.bf16 %v4193_v29, %v312_v63  ;;  %v1580_v12 = vrot.slane %v4350_v2, %v4167_v17  ;;  %v2941_v2 = vld [vmem:[%s5146_s5 + $0xc8] sm:$0xff] }
 0x183   :  { %v2196_v15 = vadd.bf16 %v2010_v36, %v1748_v9  ;;  %v2014_v21 = vpop.permute.xlu1 %2013  ;;  %v3221_v9 = vcombine.low %v2211_v39, %v2212_v50  ;;  %v132_v24 = vrot.slane %v3722_v40, %v4167_v17  ;;  %v1296_v42 = vmul.bf16 %v4231_v33, %v1156_v35  ;;  %v5237_v39 = vld [vmem:[#allocation43_spill] sm:$0xff] }
 0x184   :  { %v2022_v14 = vrot.slane %v2014_v21, %v4167_v17  ;;  %v2026_v38 = vpop.permute.xlu0 %2025  ;;  %v1733_v55 = vadd.bf16 %v1701_v51, %v1309_v53  ;;  %v1734_v18 = vadd.bf16 %v1702_v31, %v1310_v49  ;;  %v120_v52 = vrot.slane %v4085_v44, %v4167_v17  ;;  %v2292_v44 = vld [vmem:[%s5144_s4 + $0x88] sm:$0xff]  ;;  %v2294_v31 = vld [vmem:[%s5144_s4 + $0x98] sm:$0xff] }
 0x185   :  { %v2034_v59 = vrot.slane %v2026_v38, %v4167_v17  ;;  %3045 = vperm.xlu0 %3388, %v2935_v34   ;;  %v2228_v54 = vmax.bf16 %v5187_v0, %v2196_v15  ;;  %v5235_v34 = vrot.slane %v3772_v57, %v4167_v17  ;;  %v903_v25 = vadd.bf16 %v871_v48, %v476_v58  ;;  %v2304_v51 = vld [vmem:[%s5144_s4 + $0xe8] sm:$0xff]  ;;  %v5239_v58 = vld [vmem:[#allocation14_spill] sm:$0xff] }
 0x186   :  { %v2197_v28 = vadd.bf16 %v2022_v14, %v1749_v22  ;;  %2364 = vperm.xlu1 %3390, %v2286_v47   ;;  %v2290_v47 = vld [vmem:[%s5144_s4 + $0x78] sm:$0xff]  ;;  %v553_v21 = vrot.slane %v3724_v41, %v4167_v17  ;;  %v542_v56 = vrot.slane %v3820_v11, %v4167_v17  ;;  %v1295_v22 = vmul.bf16 %v4231_v33, %v1145_v46 }
 0x187   :  { %v2198_v26 = vadd.bf16 %v2034_v59, %v1750_v7  ;;  %v1822_v1 = vpop.permute.xlu1 %1821  ;;  %v3229_v27 = vcombine.low %v2227_v16, %v2228_v54  ;;  %v872_v6 = vmul.bf16 %v4173_v30, %v5235_v34  ;;  %v1569_v38 = vrot.slane %v4009_v62, %v4167_v17  ;;  %v5238_v34 = vld [vmem:[#allocation13_spill] sm:$0xff] }
 0x188   :  { %v2229_v19 = vmax.bf16 %v5187_v0, %v2197_v28  ;;  %v1830_v8 = vrot.slane %v1822_v1, %v4167_v17  ;;  %v2050_v14 = vpop.permute.xlu0 %2049  ;;  %v1720_v7 = vmul.bf16 %v4237_v3, %v1580_v12  ;;  %v980_v11 = vrot.slane %v3947_v13, %v4167_v17  ;;  %v5236_v1 = vld [vmem:[#allocation65_spill] sm:$0xff]  ;;  %v5241_v12 = vld [vmem:[#allocation34_spill] sm:$0xff] }
 0x189   :  { %v2230_v32 = vmax.bf16 %v5187_v0, %v2198_v26  ;;  %3055 = vperm.xlu0 %3388, %v2937_v61   ;;  %3237 = vmatprep.subr.bf16.mxu0 %v3229_v27  ;;  %v904_v40 = vadd.bf16 %v872_v6, %v4375_v37  ;;  %v460_v54 = vmul.bf16 %v4193_v29, %v120_v52 }
 0x18a   :  { %3349 = vmatprep.subr.bf16.mxu1 %v3229_v27  ;;  %2374 = vperm.xlu1 %3390, %v2288_v5   ;;  %v2181_v23 = vadd.bf16 %v1830_v8, %v1733_v55  ;;  %v1327_v50 = vadd.bf16 %v1295_v22, %v903_v25  ;;  %v2058_v20 = vrot.slane %v2050_v14, %v4167_v17  ;;  %v2298_v14 = vld [vmem:[%s5144_s4 + $0xb8] sm:$0xff] }
 0x18b   :  { %3238 = vmatpush3.bf16.msra.mxu0 %v3221_v9  ;;  %3357 = vmatpush3.bf16.msra.mxu1 %v3221_v9  ;;  %v1834_v36 = vpop.permute.xlu1 %1833  ;;  %v3230_v57 = vcombine.low %v2229_v19, %v2230_v32  ;;  %v1328_v16 = vadd.bf16 %v1296_v42, %v904_v40  ;;  %v461_v63 = vmul.bf16 %v4193_v29, %v132_v24  ;;  %v2305_v32 = vld [vmem:[%s5144_s4 + $0xf0] sm:$0xff]  ;;  %v5242_v24 = vld [vmem:[#allocation56_spill] sm:$0xff]  ;;  %v2306_v40 = vld [vmem:[%s5144_s4 + $0xf8] sm:$0xff] }
 0x18c   :  { %v1842_v4 = vrot.slane %v1834_v36, %v4167_v17  ;;  %v2213_v59 = vmax.bf16 %v5187_v0, %v2181_v23  ;;  %v856_v28 = vmul.bf16 %v4173_v30, %v553_v21  ;;  %v969_v13 = vrot.slane %v3815_v10, %v4167_v17  ;;  %v5240_v36 = vld [vmem:[#allocation75_spill] sm:$0xff] }
 0x18d   :  { %3065 = vperm.xlu0 %3388, %v2939_v45   ;;  %3239 = vmatprep.subr.bf16.mxu0 %v3230_v57  ;;  %v855_v61 = vmul.bf16 %v4173_v30, %v542_v56  ;;  %v1719_v26 = vmul.bf16 %v4237_v3, %v1569_v38  ;;  %v1393_v27 = vrot.slane %v5236_v1, %v4167_v17  ;;  %v2296_v45 = vld [vmem:[%s5144_s4 + $0xa8] sm:$0xff] }
 0x18e   :  { %v2182_v15 = vadd.bf16 %v1842_v4, %v1734_v18  ;;  %3350 = vmatprep.subr.bf16.mxu1 %v3230_v57  ;;  %2384 = vperm.xlu1 %3390, %v2290_v47   ;;  %v1752_v5 = vadd.bf16 %v1720_v7, %v1328_v16  ;;  %v1404_v53 = vrot.slane %v5237_v39, %v4167_v17  ;;  %v5246_v39 = vld [vmem:[#allocation4_spill] sm:$0xff] }
 0x18f   :  { %v1280_v60 = vmul.bf16 %v4231_v33, %v980_v11  ;;  %v887_v49 = vadd.bf16 %v855_v61, %v460_v54  ;;  %v1751_v8 = vadd.bf16 %v1719_v26, %v1327_v50  ;;  %v888_v9 = vadd.bf16 %v856_v28, %v461_v63  ;;  %v2300_v28 = vld [vmem:[%s5144_s4 + $0xc8] sm:$0xff] }
 0x190   :  { %v2214_v41 = vmax.bf16 %v5187_v0, %v2182_v15  ;;  %v4449_v37 = vpop.permute.xlu1 %1593  ;;  %v2200_v19 = vadd.bf16 %v2058_v20, %v1752_v5  ;;  %v348_v6 = vrot.slane %v5238_v34, %v4167_v17  ;;  %v751_v55 = vrot.slane %v5239_v58, %v4167_v17 }
 0x191   :  { %3075 = vperm.xlu0 %3388, %v2941_v2   ;;  %v1279_v46 = vmul.bf16 %v4231_v33, %v969_v13  ;;  %v1703_v48 = vmul.bf16 %v4237_v3, %v1393_v27  ;;  %v336_v57 = vrot.slane %v5240_v36, %v4167_v17  ;;  %v740_v23 = vrot.slane %v5241_v12, %v4167_v17  ;;  %v5244_v13 = vld [vmem:[#allocation64_spill] sm:$0xff]  ;;  %v5245_v27 = vld [vmem:[#allocation3_spill] sm:$0xff] }
 0x192   :  { %2394 = vperm.xlu1 %3390, %v2292_v44   ;;  %v3222_v62 = vcombine.low %v2213_v59, %v2214_v41  ;;  %v1704_v18 = vmul.bf16 %v4237_v3, %v1404_v53  ;;  %v1312_v4 = vadd.bf16 %v1280_v60, %v888_v9  ;;  %v1178_v42 = vrot.slane %v5242_v24, %v4167_v17  ;;  %v5243_v41 = vld [vmem:[#allocation33_spill] sm:$0xff]  ;;  %v5247_v60 = vld [vmem:[#allocation24_spill] sm:$0xff] }
 0x193   :  { %v2232_v25 = vmax.bf16 %v5187_v0, %v2200_v19  ;;  %v1311_v2 = vadd.bf16 %v1279_v46, %v887_v49  ;;  %v479_v56 = vmul.bf16 %v4193_v29, %v348_v6  ;;  %v874_v22 = vmul.bf16 %v4173_v30, %v751_v55  ;;  %v5248_v19 = vld [vmem:[#allocation54_spill] sm:$0xff]  ;;  %v2074_v55 = vpop.permute.xlu0 %2073 }
 0x194   :  { %3240 = vmatpush3.bf16.msra.mxu0 %v3222_v62  ;;  %3358 = vmatpush3.bf16.msra.mxu1 %v3222_v62  ;;  %v478_v44 = vmul.bf16 %v4193_v29, %v336_v57  ;;  %v1602_v38 = vrot.slane %v4449_v37, %v4167_v17  ;;  %v1167_v11 = vrot.slane %v5243_v41, %v4167_v17  ;;  %v2946_v37 = vld [vmem:[%s5146_s5 + $0xf0] sm:$0xff]  ;;  %v5249_v6 = vld [vmem:[#allocation46_spill] sm:$0xff] }
 0x195   :  { %v2038_v10 = vpop.permute.xlu1 %2037  ;;  %2454 = vperm.xlu0 %3388, %v2304_v51   ;;  %v1735_v7 = vadd.bf16 %v1703_v48, %v1311_v2  ;;  %v873_v16 = vmul.bf16 %v4173_v30, %v740_v23  ;;  %v1736_v50 = vadd.bf16 %v1704_v18, %v1312_v4  ;;  %v1298_v20 = vmul.bf16 %v4231_v33, %v1178_v42  ;;  %v5250_v23 = vld [vmem:[#allocation23_spill] sm:$0xff] }
 0x196   :  { %v2046_v35 = vrot.slane %v2038_v10, %v4167_v17  ;;  %2404 = vperm.xlu1 %3390, %v2294_v31   ;;  %v906_v63 = vadd.bf16 %v874_v22, %v479_v56  ;;  %v144_v61 = vrot.slane %v5244_v13, %v4167_v17  ;;  %v1722_v26 = vmul.bf16 %v4237_v3, %v1602_v38  ;;  %v5251_v42 = vld [vmem:[#allocation67_spill] sm:$0xff] }
 0x197   :  { %v905_v31 = vadd.bf16 %v873_v16, %v478_v44  ;;  %v156_v5 = vrot.slane %v5245_v27, %v4167_v17  ;;  %v575_v53 = vrot.slane %v5246_v39, %v4167_v17  ;;  %v564_v10 = vrot.slane %v5247_v60, %v4167_v17  ;;  %v2916_v56 = vld [vmem:[%s5146_s5] sm:$0xff] }
 0x198   :  { %v2199_v47 = vadd.bf16 %v2046_v35, %v1751_v8  ;;  %v1297_v49 = vmul.bf16 %v4231_v33, %v1167_v11  ;;  %v1591_v8 = vrot.slane %v5248_v19, %v4167_v17  ;;  %v1330_v35 = vadd.bf16 %v1298_v20, %v906_v63  ;;  %v5254_v11 = vld [vmem:[#allocation16_spill] sm:$0xff] }
 0x199   :  { %v1846_v52 = vpop.permute.xlu1 %1845  ;;  %2459 = vperm.xlu0 %3388, %v2305_v32   ;;  %v1002_v58 = vrot.slane %v5249_v6, %v4167_v17  ;;  %v462_v46 = vmul.bf16 %v4193_v29, %v144_v61  ;;  %v858_v12 = vmul.bf16 %v4173_v30, %v575_v53  ;;  %v991_v18 = vrot.slane %v5250_v23, %v4167_v17  ;;  %v5255_v20 = vld [vmem:[#allocation76_spill] sm:$0xff]  ;;  %v5257_v61 = vld [vmem:[#allocation58_spill] sm:$0xff] }
 0x19a   :  { %v2231_v15 = vmax.bf16 %v5187_v0, %v2199_v47  ;;  %v1854_v21 = vrot.slane %v1846_v52, %v4167_v17  ;;  %2414 = vperm.xlu1 %3390, %v2296_v45   ;;  %v2302_v45 = vld [vmem:[%s5144_s4 + $0xd8] sm:$0xff]  ;;  %v1754_v48 = vadd.bf16 %v1722_v26, %v1330_v35  ;;  %v1329_v57 = vadd.bf16 %v1297_v49, %v905_v31 }
 0x19b   :  { %v463_v47 = vmul.bf16 %v4193_v29, %v156_v5  ;;  %v857_v4 = vmul.bf16 %v4173_v30, %v564_v10  ;;  %v1721_v24 = vmul.bf16 %v4237_v3, %v1591_v8  ;;  %v1415_v52 = vrot.slane %v5251_v42, %v4167_v17  ;;  %v5261_v42 = vld [vmem:[#allocation6_spill] sm:$0xff] }
 0x19c   :  { %v3231_v59 = vcombine.low %v2231_v15, %v2232_v25  ;;  %v2183_v62 = vadd.bf16 %v1854_v21, %v1735_v7  ;;  %v2082_v25 = vrot.slane %v2074_v55, %v4167_v17  ;;  %v5252_v15 = vld [vmem:[#allocation44_spill] sm:$0xff]  ;;  %v1282_v21 = vmul.bf16 %v4231_v33, %v1002_v58 }
 0x19d   :  { %v1858_v54 = vpop.permute.xlu1 %1857  ;;  %2464 = vperm.xlu0 %3388, %v2306_v40   ;;  %v1426_v2 = vrot.slane %v5252_v15, %v4167_v17  ;;  %v889_v22 = vadd.bf16 %v857_v4, %v462_v46  ;;  %v1753_v44 = vadd.bf16 %v1721_v24, %v1329_v57  ;;  %v890_v7 = vadd.bf16 %v858_v12, %v463_v47  ;;  %v5259_v57 = vld [vmem:[#allocation66_spill] sm:$0xff]  ;;  %v5260_v4 = vld [vmem:[#allocation5_spill] sm:$0xff] }
 0x19e   :  { %v1866_v51 = vrot.slane %v1858_v54, %v4167_v17  ;;  %2424 = vperm.xlu1 %3390, %v2298_v14   ;;  %3241 = vmatprep.subr.bf16.mxu0 %v3231_v59  ;;  %v2215_v32 = vmax.bf16 %v5187_v0, %v2183_v62  ;;  %v2202_v14 = vadd.bf16 %v2082_v25, %v1754_v48  ;;  %v5262_v25 = vld [vmem:[#allocation26_spill] sm:$0xff] }
 0x19f   :  { %3351 = vmatprep.subr.bf16.mxu1 %v3231_v59  ;;  %v5253_v59 = vld [vmem:[#allocation15_spill] sm:$0xff]  ;;  %v773_v16 = vrot.slane %v5254_v11, %v4167_v17  ;;  %v1281_v54 = vmul.bf16 %v4231_v33, %v991_v18  ;;  %v360_v62 = vrot.slane %v5255_v20, %v4167_v17  ;;  %v1314_v13 = vadd.bf16 %v1282_v21, %v890_v7  ;;  %v2922_v21 = vld [vmem:[%s5146_s5 + $0x30] sm:$0xff]  ;;  %v5264_v7 = vld [vmem:[#allocation48_spill] sm:$0xff] }
 0x1a0   :  { %v2184_v1 = vadd.bf16 %v1866_v51, %v1736_v50  ;;  %v372_v41 = vrot.slane %v5253_v59, %v4167_v17  ;;  %v1705_v50 = vmul.bf16 %v4237_v3, %v1415_v52  ;;  %v1200_v31 = vrot.slane %v5257_v61, %v4167_v17  ;;  %v5266_v61 = vld [vmem:[#allocation69_spill] sm:$0xff] }
 0x1a1   :  { %3100 = vperm.xlu0 %3388, %v2946_v37   ;;  %v5256_v37 = vld [vmem:[#allocation36_spill] sm:$0xff]  ;;  %v1313_v5 = vadd.bf16 %v1281_v54, %v889_v22  ;;  %v2234_v53 = vmax.bf16 %v5187_v0, %v2202_v14  ;;  %v876_v10 = vmul.bf16 %v4173_v30, %v773_v16  ;;  %v480_v49 = vmul.bf16 %v4193_v29, %v360_v62 }
 0x1a2   :  { %v2216_v9 = vmax.bf16 %v5187_v0, %v2184_v1  ;;  %2434 = vperm.xlu1 %3390, %v2300_v28   ;;  %v4531_v34 = vpop.permute.xlu1 %1615  ;;  %v762_v63 = vrot.slane %v5256_v37, %v4167_v17  ;;  %v1706_v28 = vmul.bf16 %v4237_v3, %v1426_v2  ;;  %v2918_v1 = vld [vmem:[%s5146_s5 + $0x10] sm:$0xff]  ;;  %v481_v60 = vmul.bf16 %v4193_v29, %v372_v41  ;;  %v2098_v41 = vpop.permute.xlu0 %2097 }
 0x1a3   :  { %v1624_v19 = vrot.slane %v4531_v34, %v4167_v17  ;;  %v1737_v8 = vadd.bf16 %v1705_v50, %v1313_v5  ;;  %v1300_v46 = vmul.bf16 %v4231_v33, %v1200_v31  ;;  %v168_v47 = vrot.slane %v5259_v57, %v4167_v17 }
 0x1a4   :  { %v3223_v36 = vcombine.low %v2215_v32, %v2216_v9  ;;  %v5258_v32 = vld [vmem:[#allocation35_spill] sm:$0xff]  ;;  %v875_v6 = vmul.bf16 %v4173_v30, %v762_v63  ;;  %v1738_v55 = vadd.bf16 %v1706_v28, %v1314_v13  ;;  %v908_v34 = vadd.bf16 %v876_v10, %v481_v60 }
 0x1a5   :  { %v1189_v9 = vrot.slane %v5258_v32, %v4167_v17  ;;  %v1724_v23 = vmul.bf16 %v4237_v3, %v1624_v19  ;;  %v180_v24 = vrot.slane %v5260_v4, %v4167_v17  ;;  %v597_v52 = vrot.slane %v5261_v42, %v4167_v17  ;;  %v2924_v28 = vld [vmem:[%s5146_s5 + $0x40] sm:$0xff]  ;;  %v5269_v32 = vld [vmem:[#allocation18_spill] sm:$0xff] }
 0x1a6   :  { %2444 = vperm.xlu1 %3390, %v2302_v45   ;;  %3242 = vmatpush3.bf16.msra.mxu0 %v3223_v36  ;;  %v2920_v45 = vld [vmem:[%s5146_s5 + $0x20] sm:$0xff]  ;;  %v907_v12 = vadd.bf16 %v875_v6, %v480_v49  ;;  %v586_v15 = vrot.slane %v5262_v25, %v4167_v17  ;;  %v1332_v22 = vadd.bf16 %v1300_v46, %v908_v34  ;;  %v2926_v6 = vld [vmem:[%s5146_s5 + $0x50] sm:$0xff] }
 0x1a7   :  { %3359 = vmatpush3.bf16.msra.mxu1 %v3223_v36  ;;  %v2062_v40 = vpop.permute.xlu1 %2061  ;;  %v1299_v2 = vmul.bf16 %v4231_v33, %v1189_v9  ;;  %v1024_v59 = vrot.slane %v5264_v7, %v4167_v17  ;;  %v464_v11 = vmul.bf16 %v4193_v29, %v168_v47  ;;  %v465_v20 = vmul.bf16 %v4193_v29, %v180_v24  ;;  %v5274_v7 = vld [vmem:[#allocation37_spill] sm:$0xff] }
 0x1a8   :  { %v2070_v38 = vrot.slane %v2062_v40, %v4167_v17  ;;  %v5263_v40 = vld [vmem:[#allocation55_spill] sm:$0xff]  ;;  %v1756_v16 = vadd.bf16 %v1724_v23, %v1332_v22  ;;  %v860_v62 = vmul.bf16 %v4173_v30, %v597_v52  ;;  %v859_v63 = vmul.bf16 %v4173_v30, %v586_v15 }
 0x1a9   :  { %v1331_v50 = vadd.bf16 %v1299_v2, %v907_v12  ;;  %v1437_v31 = vrot.slane %v5266_v61, %v4167_v17  ;;  %v1284_v5 = vmul.bf16 %v4231_v33, %v1024_v59  ;;  %v795_v9 = vrot.slane %v5269_v32, %v4167_v17  ;;  %v5272_v12 = vld [vmem:[#allocation60_spill] sm:$0xff]  ;;  %v2928_v2 = vld [vmem:[%s5146_s5 + $0x60] sm:$0xff]  ;;  %v2930_v61 = vld [vmem:[%s5146_s5 + $0x70] sm:$0xff] }
 0x1aa   :  { %v2201_v51 = vadd.bf16 %v2070_v38, %v1753_v44  ;;  %2950 = vperm.xlu1 %3390, %v2916_v56   ;;  %v1613_v56 = vrot.slane %v5263_v40, %v4167_v17  ;;  %v892_v19 = vadd.bf16 %v860_v62, %v465_v20  ;;  %v1222_v23 = vrot.slane %v5272_v12, %v4167_v17 }
 0x1ab   :  { %v1870_v26 = vpop.permute.xlu1 %1869  ;;  %v878_v15 = vmul.bf16 %v4173_v30, %v795_v9  ;;  %v1211_v59 = vrot.slane %v5274_v7, %v4167_v17 }
 0x1ac   :  { %v2233_v27 = vmax.bf16 %v5187_v0, %v2201_v51  ;;  %v1878_v39 = vrot.slane %v1870_v26, %v4167_v17  ;;  %v5265_v51 = vld [vmem:[#allocation25_spill] sm:$0xff]  ;;  %v1723_v13 = vmul.bf16 %v4237_v3, %v1613_v56  ;;  %v2106_v26 = vrot.slane %v2098_v41, %v4167_v17 }
 0x1ad   :  { %v1013_v37 = vrot.slane %v5265_v51, %v4167_v17  ;;  %v1316_v47 = vadd.bf16 %v1284_v5, %v892_v19  ;;  %v5276_v51 = vld [vmem:[#allocation9_spill] sm:$0xff] }
 0x1ae   :  { %2960 = vperm.xlu1 %3390, %v2918_v1   ;;  %v3232_v35 = vcombine.low %v2233_v27, %v2234_v53  ;;  %v2185_v48 = vadd.bf16 %v1878_v39, %v1737_v8  ;;  %v5267_v1 = vld [vmem:[#allocation45_spill] sm:$0xff]  ;;  %v891_v53 = vadd.bf16 %v859_v63, %v464_v11  ;;  %v2204_v60 = vadd.bf16 %v2106_v26, %v1756_v16  ;;  %v5277_v63 = vld [vmem:[#allocation10_spill] sm:$0xff] }
 0x1af   :  { %v1882_v58 = vpop.permute.xlu1 %1881  ;;  %v1448_v27 = vrot.slane %v5267_v1, %v4167_v17  ;;  %v1755_v10 = vadd.bf16 %v1723_v13, %v1331_v50  ;;  %v5268_v8 = vld [vmem:[#allocation17_spill] sm:$0xff] }
 0x1b0   :  { %v1890_v36 = vrot.slane %v1882_v58, %v4167_v17  ;;  %3243 = vmatprep.subr.bf16.mxu0 %v3232_v35  ;;  %3352 = vmatprep.subr.bf16.mxu1 %v3232_v35  ;;  %v2217_v14 = vmax.bf16 %v5187_v0, %v2185_v48  ;;  %v396_v35 = vrot.slane %v5268_v8, %v4167_v17 }
 0x1b1   :  { %v1283_v58 = vmul.bf16 %v4231_v33, %v1013_v37  ;;  %v1708_v57 = vmul.bf16 %v4237_v3, %v1448_v27  ;;  %v2236_v52 = vmax.bf16 %v5187_v0, %v2204_v60  ;;  %v228_v37 = vrot.slane %v5276_v51, %v4167_v17 }
 0x1b2   :  { %v2186_v18 = vadd.bf16 %v1890_v36, %v1738_v55  ;;  %2970 = vperm.xlu1 %3390, %v2920_v45   ;;  %v1707_v55 = vmul.bf16 %v4237_v3, %v1437_v31  ;;  %v5270_v45 = vld [vmem:[#allocation77_spill] sm:$0xff]  ;;  %v5271_v36 = vld [vmem:[#allocation38_spill] sm:$0xff]  ;;  %v483_v25 = vmul.bf16 %v4193_v29, %v396_v35  ;;  %v5278_v31 = vld [vmem:[#allocation68_spill] sm:$0xff] }
 0x1b3   :  { %v384_v46 = vrot.slane %v5270_v45, %v4167_v17  ;;  %v784_v34 = vrot.slane %v5271_v36, %v4167_v17  ;;  %v1315_v24 = vadd.bf16 %v1283_v58, %v891_v53  ;;  %v1740_v16 = vadd.bf16 %v1708_v57, %v1316_v47  ;;  %v5279_v53 = vld [vmem:[#allocation28_spill] sm:$0xff]  ;;  %v5281_v45 = vld [vmem:[#allocation50_spill] sm:$0xff]  ;;  %v2932_v36 = vld [vmem:[%s5146_s5 + $0x80] sm:$0xff] }
 0x1b4   :  { %v2218_v44 = vmax.bf16 %v5187_v0, %v2186_v18  ;;  %v4604_v38 = vpop.permute.xlu1 %1637  ;;  %v910_v13 = vadd.bf16 %v878_v15, %v483_v25  ;;  %v192_v26 = vrot.slane %v5278_v31, %v4167_v17  ;;  %v608_v60 = vrot.slane %v5279_v53, %v4167_v17  ;;  %v5290_v31 = vld [vmem:[#allocation40_spill] sm:$0xff] }
 0x1b5   :  { %v1646_v40 = vrot.slane %v4604_v38, %v4167_v17  ;;  %v1739_v56 = vadd.bf16 %v1707_v55, %v1315_v24  ;;  %v877_v41 = vmul.bf16 %v4173_v30, %v784_v34  ;;  %v5275_v38 = vld [vmem:[#allocation8_spill] sm:$0xff]  ;;  %v4683_v58 = vmul.bf16 %v4193_v29, %v228_v37 }
 0x1b6   :  { %2980 = vperm.xlu1 %3390, %v2922_v21   ;;  %v3224_v54 = vcombine.low %v2217_v14, %v2218_v44  ;;  %v482_v21 = vmul.bf16 %v4193_v29, %v384_v46  ;;  %v5273_v14 = vld [vmem:[#allocation7_spill] sm:$0xff]  ;;  %v619_v62 = vrot.slane %v5275_v38, %v4167_v17  ;;  %v1046_v46 = vrot.slane %v5281_v45, %v4167_v17 }
 0x1b7   :  { %v204_v44 = vrot.slane %v5273_v14, %v4167_v17  ;;  %v1726_v27 = vmul.bf16 %v4237_v3, %v1646_v40  ;;  %v466_v34 = vmul.bf16 %v4193_v29, %v192_v26  ;;  %v2934_v14 = vld [vmem:[%s5146_s5 + $0x90] sm:$0xff]  ;;  %v806_v26 = vrot.slane %v5290_v31, %v4167_v17 }
 0x1b8   :  { %3244 = vmatpush3.bf16.msra.mxu0 %v3224_v54  ;;  %3360 = vmatpush3.bf16.msra.mxu1 %v3224_v54  ;;  %v1302_v54 = vmul.bf16 %v4231_v33, %v1222_v23  ;;  %v909_v1 = vadd.bf16 %v877_v41, %v482_v21  ;;  %v5282_v23 = vld [vmem:[#allocation27_spill] sm:$0xff] }
 0x1b9   :  { %v2086_v39 = vpop.permute.xlu1 %2085  ;;  %v5284_v21 = vld [vmem:[#allocation47_spill] sm:$0xff] }
 0x1ba   :  { %v2094_v49 = vrot.slane %v2086_v39, %v4167_v17  ;;  %2990 = vperm.xlu1 %3390, %v2924_v28   ;;  %v641_v28 = vrot.slane %v5277_v63, %v4167_v17  ;;  %v467_v39 = vmul.bf16 %v4193_v29, %v204_v44  ;;  %v1334_v8 = vadd.bf16 %v1302_v54, %v910_v13  ;;  %v5286_v54 = vld [vmem:[#allocation12_spill] sm:$0xff] }
 0x1bb   :  { %v1470_v40 = vrot.slane %v5284_v21, %v4167_v17 }
 0x1bc   :  { %v2203_v48 = vadd.bf16 %v2094_v49, %v1755_v10  ;;  %v1301_v10 = vmul.bf16 %v4231_v33, %v1211_v59  ;;  %v5280_v49 = vld [vmem:[#allocation57_spill] sm:$0xff]  ;;  %v4686_v55 = vmul.bf16 %v4173_v30, %v641_v28  ;;  %v1758_v57 = vadd.bf16 %v1726_v27, %v1334_v8  ;;  %v5289_v28 = vld [vmem:[#allocation78_spill] sm:$0xff] }
 0x1bd   :  { %v1894_v18 = vpop.permute.xlu1 %1893  ;;  %v1635_v19 = vrot.slane %v5280_v49, %v4167_v17  ;;  %v408_v13 = vrot.slane %v5289_v28, %v4167_v17 }
 0x1be   :  { %v2235_v4 = vmax.bf16 %v5187_v0, %v2203_v48  ;;  %v1902_v42 = vrot.slane %v1894_v18, %v4167_v17  ;;  %3000 = vperm.xlu1 %3390, %v2926_v6   ;;  %v862_v6 = vmul.bf16 %v4173_v30, %v619_v62  ;;  %v2122_v48 = vpop.permute.xlu0 %2121  ;;  %v1333_v12 = vadd.bf16 %v1301_v10, %v909_v1  ;;  %v5288_v62 = vld [vmem:[#allocation20_spill] sm:$0xff] }
 0x1bf   :  { %v1035_v18 = vrot.slane %v5282_v23, %v4167_v17  ;;  %v1725_v24 = vmul.bf16 %v4237_v3, %v1635_v19  ;;  %v2130_v25 = vrot.slane %v2122_v48, %v4167_v17  ;;  %v817_v51 = vrot.slane %v5288_v62, %v4167_v17  ;;  %v5294_v23 = vld [vmem:[#allocation39_spill] sm:$0xff] }
 0x1c0   :  { %v3233_v22 = vcombine.low %v2235_v4, %v2236_v52  ;;  %v2187_v50 = vadd.bf16 %v1902_v42, %v1739_v56  ;;  %v861_v4 = vmul.bf16 %v4173_v30, %v608_v60  ;;  %v5283_v42 = vld [vmem:[#allocation71_spill] sm:$0xff]  ;;  %v894_v15 = vadd.bf16 %v862_v6, %v467_v39  ;;  %v5292_v6 = vld [vmem:[#allocation21_spill] sm:$0xff] }
 0x1c1   :  { %v1906_v11 = vpop.permute.xlu1 %1905  ;;  %v1459_v52 = vrot.slane %v5283_v42, %v4167_v17  ;;  %v1286_v56 = vmul.bf16 %v4231_v33, %v1046_v46  ;;  %v2206_v7 = vadd.bf16 %v2130_v25, %v1758_v57  ;;  %v1757_v59 = vadd.bf16 %v1725_v24, %v1333_v12  ;;  %v2936_v60 = vld [vmem:[%s5146_s5 + $0xa0] sm:$0xff]  ;;  %v5293_v46 = vld [vmem:[#allocation22_spill] sm:$0xff] }
 0x1c2   :  { %v1914_v20 = vrot.slane %v1906_v11, %v4167_v17  ;;  %3010 = vperm.xlu1 %3390, %v2928_v2   ;;  %3245 = vmatprep.subr.bf16.mxu0 %v3233_v22  ;;  %v2219_v35 = vmax.bf16 %v5187_v0, %v2187_v50  ;;  %v896_v2 = vadd.bf16 %v4686_v55, %v4683_v58  ;;  %v5285_v11 = vld [vmem:[#allocation11_spill] sm:$0xff] }
 0x1c3   :  { %3353 = vmatprep.subr.bf16.mxu1 %v3233_v22  ;;  %v893_v44 = vadd.bf16 %v861_v4, %v466_v34  ;;  %v663_v50 = vrot.slane %v5286_v54, %v4167_v17  ;;  %v1285_v37 = vmul.bf16 %v4231_v33, %v1035_v18  ;;  %v1709_v63 = vmul.bf16 %v4237_v3, %v1459_v52  ;;  %v2938_v52 = vld [vmem:[%s5146_s5 + $0xb0] sm:$0xff]  ;;  %v5297_v54 = vld [vmem:[#allocation30_spill] sm:$0xff]  ;;  %v5310_v55 = vld [vmem:[#allocation51_spill] sm:$0xff] }
 0x1c4   :  { %v2188_v5 = vadd.bf16 %v1914_v20, %v1740_v16  ;;  %v252_v16 = vrot.slane %v5285_v11, %v4167_v17  ;;  %v5287_v20 = vld [vmem:[#allocation19_spill] sm:$0xff]  ;;  %v1710_v1 = vmul.bf16 %v4237_v3, %v1470_v40  ;;  %v1318_v27 = vadd.bf16 %v1286_v56, %v894_v15 }
 0x1c5   :  { %v420_v38 = vrot.slane %v5287_v20, %v4167_v17  ;;  %v1317_v49 = vadd.bf16 %v1285_v37, %v893_v44  ;;  %v2238_v8 = vmax.bf16 %v5187_v0, %v2206_v7  ;;  %v444_v45 = vrot.slane %v5292_v6, %v4167_v17  ;;  %v5296_v44 = vld [vmem:[#allocation29_spill] sm:$0xff]  ;;  %v5298_v37 = vld [vmem:[#allocation59_spill] sm:$0xff] }
 0x1c6   :  { %v2220_v32 = vmax.bf16 %v5187_v0, %v2188_v5  ;;  %3020 = vperm.xlu1 %3390, %v2930_v61   ;;  %v4679_v9 = vpop.permute.xlu1 %1659  ;;  %v5291_v5 = vld [vmem:[#allocation62_spill] sm:$0xff]  ;;  %v839_v48 = vrot.slane %v5293_v46, %v4167_v17  ;;  %v4743_v12 = vmul.bf16 %v4193_v29, %v252_v16  ;;  %v1233_v18 = vrot.slane %v5294_v23, %v4167_v17  ;;  %v2942_v46 = vld [vmem:[%s5146_s5 + $0xd0] sm:$0xff] }
 0x1c7   :  { %v1244_v39 = vrot.slane %v5291_v5, %v4167_v17  ;;  %v1668_v34 = vrot.slane %v4679_v9, %v4167_v17  ;;  %v1741_v57 = vadd.bf16 %v1709_v63, %v1317_v49  ;;  %v879_v4 = vmul.bf16 %v4173_v30, %v806_v26  ;;  %v5299_v26 = vld [vmem:[#allocation42_spill] sm:$0xff] }
 0x1c8   :  { %v3225_v47 = vcombine.low %v2219_v35, %v2220_v32  ;;  %v485_v35 = vmul.bf16 %v4193_v29, %v420_v38  ;;  %v880_v32 = vmul.bf16 %v4173_v30, %v817_v51  ;;  %v1742_v42 = vadd.bf16 %v1710_v1, %v1318_v27  ;;  %v2940_v51 = vld [vmem:[%s5146_s5 + $0xc0] sm:$0xff]  ;;  %v5300_v1 = vld [vmem:[#allocation52_spill] sm:$0xff] }
 0x1c9   :  { %v1304_v25 = vmul.bf16 %v4231_v33, %v1244_v39  ;;  %v4754_v40 = vmul.bf16 %v4193_v29, %v444_v45  ;;  %v4757_v56 = vmul.bf16 %v4173_v30, %v839_v48  ;;  %v1057_v7 = vrot.slane %v5296_v44, %v4167_v17  ;;  %v2146_v39 = vpop.permute.xlu0 %2145 }
 0x1ca   :  { %3030 = vperm.xlu1 %3390, %v2932_v36   ;;  %3246 = vmatpush3.bf16.msra.mxu0 %v3225_v47  ;;  %v484_v36 = vmul.bf16 %v4193_v29, %v408_v13  ;;  %v912_v21 = vadd.bf16 %v880_v32, %v485_v35  ;;  %v4765_v16 = vmul.bf16 %v4173_v30, %v663_v50  ;;  %v5302_v32 = vld [vmem:[#allocation49_spill] sm:$0xff] }
 0x1cb   :  { %3361 = vmatpush3.bf16.msra.mxu1 %v3225_v47  ;;  %v2110_v22 = vpop.permute.xlu1 %2109  ;;  %v630_v20 = vrot.slane %v5297_v54, %v4167_v17  ;;  %v1303_v38 = vmul.bf16 %v4231_v33, %v1233_v18  ;;  %v432_v62 = vrot.slane %v4338_v43, %v4167_v17  ;;  %v1657_v63 = vrot.slane %v5298_v37, %v4167_v17 }
 0x1cc   :  { %v2118_v41 = vrot.slane %v2110_v22, %v4167_v17  ;;  %v5295_v22 = vld [vmem:[#allocation70_spill] sm:$0xff]  ;;  %v1336_v28 = vadd.bf16 %v1304_v25, %v912_v21  ;;  %v914_v31 = vadd.bf16 %v4757_v56, %v4754_v40  ;;  %v828_v43 = vrot.slane %v5299_v26, %v4167_v17 }
 0x1cd   :  { %v1068_v27 = vrot.slane %v5300_v1, %v4167_v17  ;;  %v1492_v6 = vrot.slane %v5302_v32, %v4167_v17  ;;  %v486_v45 = vmul.bf16 %v4193_v29, %v432_v62  ;;  %v1727_v48 = vmul.bf16 %v4237_v3, %v1657_v63  ;;  %v2947_v40 = vld [vmem:[%s5146_s5 + $0xf8] sm:$0xff] }
 0x1ce   :  { %v2205_v61 = vadd.bf16 %v2118_v41, %v1757_v59  ;;  %3040 = vperm.xlu1 %3390, %v2934_v14   ;;  %v216_v14 = vrot.slane %v5295_v22, %v4167_v17  ;;  %v911_v59 = vadd.bf16 %v879_v4, %v484_v36  ;;  %v1728_v41 = vmul.bf16 %v4237_v3, %v1668_v34  ;;  %v5303_v36 = vld [vmem:[#allocation73_spill] sm:$0xff]  ;;  %v5304_v4 = vld [vmem:[#allocation72_spill] sm:$0xff] }
 0x1cf   :  { %v1918_v53 = vpop.permute.xlu1 %1917  ;;  %v1481_v34 = vrot.slane %v5303_v36, %v4167_v17  ;;  %v1288_v23 = vmul.bf16 %v4231_v33, %v1068_v27  ;;  %v5306_v22 = vld [vmem:[#allocation32_spill] sm:$0xff]  ;;  %v1712_v54 = vmul.bf16 %v4237_v3, %v1492_v6 }
 0x1d0   :  { %v2237_v10 = vmax.bf16 %v5187_v0, %v2205_v61  ;;  %v1926_v19 = vrot.slane %v1918_v53, %v4167_v17  ;;  %v468_v5 = vmul.bf16 %v4193_v29, %v216_v14  ;;  %v1287_v53 = vmul.bf16 %v4231_v33, %v1057_v7  ;;  %v5307_v7 = vld [vmem:[#allocation53_spill] sm:$0xff] }
 0x1d1   :  { %v1335_v49 = vadd.bf16 %v1303_v38, %v911_v59  ;;  %v652_v14 = vrot.slane %v5306_v22, %v4167_v17  ;;  %v1090_v59 = vrot.slane %v5307_v7, %v4167_v17  ;;  %v1711_v62 = vmul.bf16 %v4237_v3, %v1481_v34 }
 0x1d2   :  { %3050 = vperm.xlu1 %3390, %v2936_v60   ;;  %v3234_v47 = vcombine.low %v2237_v10, %v2238_v8  ;;  %v2189_v9 = vadd.bf16 %v1926_v19, %v1741_v57  ;;  %v1760_v60 = vadd.bf16 %v1728_v41, %v1336_v28  ;;  %v863_v19 = vmul.bf16 %v4173_v30, %v630_v20  ;;  %v5301_v8 = vld [vmem:[#allocation41_spill] sm:$0xff]  ;;  %v5308_v20 = vld [vmem:[#allocation63_spill] sm:$0xff] }
 0x1d3   :  { %v1930_v24 = vpop.permute.xlu1 %1929  ;;  %v1255_v35 = vrot.slane %v5301_v8, %v4167_v17  ;;  %v2154_v57 = vrot.slane %v2146_v39, %v4167_v17  ;;  %v1266_v38 = vrot.slane %v5308_v20, %v4167_v17  ;;  %v1320_v63 = vadd.bf16 %v1288_v23, %v896_v2  ;;  %v5309_v28 = vld [vmem:[#allocation61_spill] sm:$0xff] }
 0x1d4   :  { %v1938_v15 = vrot.slane %v1930_v24, %v4167_v17  ;;  %3247 = vmatprep.subr.bf16.mxu0 %v3234_v47  ;;  %3354 = vmatprep.subr.bf16.mxu1 %v3234_v47  ;;  %v2221_v13 = vmax.bf16 %v5187_v0, %v2189_v9  ;;  %v881_v47 = vmul.bf16 %v4173_v30, %v828_v43 }
 0x1d5   :  { %v895_v18 = vadd.bf16 %v863_v19, %v468_v5  ;;  %v240_v24 = vrot.slane %v5304_v4, %v4167_v17  ;;  %v2208_v9 = vadd.bf16 %v2154_v57, %v1760_v60  ;;  %v1305_v44 = vmul.bf16 %v4231_v33, %v1255_v35 }
 0x1d6   :  { %v2190_v11 = vadd.bf16 %v1938_v15, %v1742_v42  ;;  %3060 = vperm.xlu1 %3390, %v2938_v52   ;;  %v5305_v52 = vld [vmem:[#allocation31_spill] sm:$0xff]  ;;  %v1759_v15 = vadd.bf16 %v1727_v48, %v1335_v49  ;;  %v913_v41 = vadd.bf16 %v881_v47, %v486_v45  ;;  %v865_v58 = vmul.bf16 %v4173_v30, %v652_v14 }
 0x1d7   :  { %v1079_v25 = vrot.slane %v5305_v52, %v4167_v17  ;;  %v1319_v43 = vadd.bf16 %v1287_v53, %v895_v18  ;;  %v2240_v39 = vmax.bf16 %v5187_v0, %v2208_v9  ;;  %v1514_v2 = vrot.slane %v5310_v55, %v4167_v17  ;;  %v2944_v53 = vld [vmem:[%s5146_s5 + $0xe0] sm:$0xff]  ;;  %v2945_v18 = vld [vmem:[%s5146_s5 + $0xe8] sm:$0xff]  ;;  %v3414_v55 = vld [vmem:[%s5147_s3 + $0xb0] ss:$8 sps:$4 sm:$0xff]  }
 0x1d8   :  { %v2222_v50 = vmax.bf16 %v5187_v0, %v2190_v11  ;;  %v4779_v61 = vpop.permute.xlu1 %1681  ;;  %v2943_v11 = vld [vmem:[%s5146_s5 + $0xd8] sm:$0xff]  ;;  %v1290_v60 = vmul.bf16 %v4231_v33, %v1090_v59  ;;  %v1744_v45 = vadd.bf16 %v1712_v54, %v1320_v63  ;;  %v898_v57 = vadd.bf16 %v4765_v16, %v4743_v12  ;;  %v3391_v63 = vld [vmem:[%s5147_s3] ss:$8 sps:$4 sm:$0xff]  }
 0x1d9   :  { %v1690_v1 = vrot.slane %v4779_v61, %v4167_v17  ;;  %v1306_v61 = vmul.bf16 %v4231_v33, %v1266_v38  ;;  %v1743_v19 = vadd.bf16 %v1711_v62, %v1319_v43  ;;  %v1289_v47 = vmul.bf16 %v4231_v33, %v1079_v25  ;;  %v3405_v43 = vld [vmem:[%s5147_s3 + $0xa4] ss:$8 sps:$4 sm:$0xff]  }
 0x1da   :  { %3070 = vperm.xlu1 %3390, %v2940_v51   ;;  %v3226_v10 = vcombine.low %v2221_v13, %v2222_v50  ;;  %v2158_v51 = vpop.permute.xlu0 %2157  ;;  %v1679_v13 = vrot.slane %v5309_v28, %v4167_v17  ;;  %v470_v50 = vmul.bf16 %v4193_v29, %v240_v24  ;;  %v1337_v29 = vadd.bf16 %v1305_v44, %v913_v41  ;;  %v3397_v28 = vld [vmem:[%s5147_s3 + $0x14] ss:$8 sps:$4 sm:$0xff]  }
 0x1db   :  { %v2166_v32 = vrot.slane %v2158_v51, %v4167_v17  ;;  %v1730_v48 = vmul.bf16 %v4237_v3, %v1690_v1  ;;  %v1714_v4 = vmul.bf16 %v4237_v3, %v1514_v2  ;;  %v1338_v24 = vadd.bf16 %v1306_v61, %v914_v31  ;;  %v3407_v1 = vld [vmem:[%s5147_s3 + $0x20] ss:$8 sps:$4 sm:$0xff]   ;;  %v3415_v2 = vld [vmem:[%s5147_s3 + $0x44] ss:$8 sps:$4 sm:$0xff]   ;;  %v3421_v61 = vld [vmem:[%s5147_s3 + $0x54] ss:$8 sps:$4 sm:$0xff]  }
 0x1dc   :  { %3248 = vmatpush3.bf16.msra.mxu0 %v3226_v10  ;;  %3362 = vmatpush3.bf16.msra.mxu1 %v3226_v10  ;;  %v5311_v10 = vld [vmem:[#allocation74_spill] sm:$0xff]  ;;  %v1729_v35 = vmul.bf16 %v4237_v3, %v1679_v13  ;;  %v897_v30 = vadd.bf16 %v865_v58, %v470_v50  ;;  %v1322_v9 = vadd.bf16 %v1290_v60, %v898_v57  ;;  %v3417_v60 = vld [vmem:[%s5147_s3 + $0xc4] ss:$8 sps:$4 sm:$0xff]  }
 0x1dd   :  { %v2134_v42 = vpop.permute.xlu1 %2133  ;;  %v1503_v49 = vrot.slane %v5311_v10, %v4167_v17  ;;  %v1762_v22 = vadd.bf16 %v1730_v48, %v1338_v24  ;;  %v3401_v13 = vld [vmem:[%s5147_s3 + $0x10] ss:$8 sps:$4 sm:$0xff]   ;;  %v3423_v10 = vld [vmem:[%s5147_s3 + $0xd4] ss:$8 sps:$4 sm:$0xff]  }
 0x1de   :  { %v2142_v21 = vrot.slane %v2134_v42, %v4167_v17  ;;  %3080 = vperm.xlu1 %3390, %v2942_v46   ;;  %v1966_v46 = vpop.permute.xlu0 %1965  ;;  %v1761_v23 = vadd.bf16 %v1729_v35, %v1337_v29  ;;  %v1321_v12 = vadd.bf16 %v1289_v47, %v897_v30  ;;  %v1746_v59 = vadd.bf16 %v1714_v4, %v1322_v9  ;;  %v3402_v50 = vld [vmem:[%s5147_s3 + $0x90] ss:$8 sps:$4 sm:$0xff]   ;;  %v3419_v29 = vld [vmem:[%s5147_s3 + $0x40] ss:$8 sps:$4 sm:$0xff]   ;;  %v3429_v35 = vld [vmem:[%s5147_s3 + $0xe4] ss:$8 sps:$4 sm:$0xff]  }
 0x1df   :  { %v1713_v42 = vmul.bf16 %v4237_v3, %v1503_v49  ;;  %v1974_v33 = vrot.slane %v1966_v46, %v4167_v17  ;;  %v3413_v58 = vld [vmem:[%s5147_s3 + $0x30] ss:$8 sps:$4 sm:$0xff]   ;;  %v3431_v30 = vld [vmem:[%s5147_s3 + $0x60] ss:$8 sps:$4 sm:$0xff]  }
 0x1e0   :  { %v2207_v37 = vadd.bf16 %v2142_v21, %v1759_v15  ;;  %v2209_v15 = vadd.bf16 %v2166_v32, %v1761_v23  ;;  %v3425_v49 = vld [vmem:[%s5147_s3 + $0x50] ss:$8 sps:$4 sm:$0xff]   ;;  %v3432_v32 = vld [vmem:[%s5147_s3 + $0xe0] ss:$8 sps:$4 sm:$0xff]  }
 0x1e1   :  { %v1942_v26 = vpop.permute.xlu1 %1941  ;;  %v1745_v3 = vadd.bf16 %v1713_v42, %v1321_v12  ;;  %v3437_v46 = vld [vmem:[%s5147_s3 + $0x70] ss:$8 sps:$4 sm:$0xff]  }
 0x1e2   :  { %v2239_v27 = vmax.bf16 %v5187_v0, %v2207_v37  ;;  %v1950_v5 = vrot.slane %v1942_v26, %v4167_v17  ;;  %3085 = vperm.xlu1 %3390, %v2943_v11   ;;  %v2241_v44 = vmax.bf16 %v5187_v0, %v2209_v15  ;;  %v3403_v26 = vld [vmem:[%s5147_s3 + $0x24] ss:$8 sps:$4 sm:$0xff]   ;;  %v3438_v48 = vld [vmem:[%s5147_s3 + $0xf0] ss:$8 sps:$4 sm:$0xff]  }
 0x1e3   :  { %v2193_v41 = vadd.bf16 %v1974_v33, %v1745_v3 }
 0x1e4   :  { %v3235_v8 = vcombine.low %v2239_v27, %v2240_v39  ;;  %v2191_v36 = vadd.bf16 %v1950_v5, %v1743_v19  ;;  %v3408_v27 = vld [vmem:[%s5147_s3 + $0xa0] ss:$8 sps:$4 sm:$0xff]   ;;  %v3409_v5 = vld [vmem:[%s5147_s3 + $0x34] ss:$8 sps:$4 sm:$0xff]   ;;  %v3426_v19 = vld [vmem:[%s5147_s3 + $0xd0] ss:$8 sps:$4 sm:$0xff]  }
 0x1e5   :  { %v1954_v6 = vpop.permute.xlu1 %1953  ;;  %v2225_v62 = vmax.bf16 %v5187_v0, %v2193_v41  ;;  %v3411_v39 = vld [vmem:[%s5147_s3 + $0xb4] ss:$8 sps:$4 sm:$0xff]  }
 0x1e6   :  { %v1962_v34 = vrot.slane %v1954_v6, %v4167_v17  ;;  %3090 = vperm.xlu1 %3390, %v2944_v53   ;;  %3249 = vmatprep.subr.bf16.mxu0 %v3235_v8  ;;  %v2223_v25 = vmax.bf16 %v5187_v0, %v2191_v36  ;;  %v3420_v53 = vld [vmem:[%s5147_s3 + $0xc0] ss:$8 sps:$4 sm:$0xff]   ;;  %v3433_v6 = vld [vmem:[%s5147_s3 + $0x74] ss:$8 sps:$4 sm:$0xff]   ;;  %v2310_v36 = vpop.permute.xlu0 %2309 }
 0x1e7   :  { %3355 = vmatprep.subr.bf16.mxu1 %v3235_v8  ;;  %v3427_v8 = vld [vmem:[%s5147_s3 + $0x64] ss:$8 sps:$4 sm:$0xff]  }
 0x1e8   :  { %v2192_v52 = vadd.bf16 %v1962_v34, %v1744_v45  ;;  %v3435_v45 = vld [vmem:[%s5147_s3 + $0xf4] ss:$8 sps:$4 sm:$0xff]  }
 0x1e9   :  { %v2170_v16 = vpop.permute.xlu1 %2169 }
 0x1ea   :  { %v2224_v21 = vmax.bf16 %v5187_v0, %v2192_v52  ;;  %v2178_v14 = vrot.slane %v2170_v16, %v4167_v17  ;;  %3095 = vperm.xlu1 %3390, %v2945_v18   ;;  %v4959_v34 = vpop.permute.xlu0 %2319 }
 0x1ec   :  { %v2210_v56 = vadd.bf16 %v2178_v14, %v1762_v22  ;;  %v3227_v31 = vcombine.low %v2223_v25, %v2224_v21 }
 0x1ed   :  { %v1978_v7 = vpop.permute.xlu1 %1977 }
 0x1ee   :  { %v2242_v11 = vmax.bf16 %v5187_v0, %v2210_v56  ;;  %v1986_v54 = vrot.slane %v1978_v7, %v4167_v17  ;;  %3105 = vperm.xlu1 %3390, %v2947_v40   ;;  %3250 = vmatpush3.bf16.msra.mxu0 %v3227_v31  ;;  %v3394_v17 = vld [vmem:[%s5147_s3 + $0x80] ss:$8 sps:$4 sm:$0xff]   ;;  %v4961_v47 = vpop.permute.xlu0 %2329 }
 0x1ef   :  { %3363 = vmatpush3.bf16.msra.mxu1 %v3227_v31 }
 0x1f0   :  { %v2194_v20 = vadd.bf16 %v1986_v54, %v1746_v59  ;;  %v3236_v38 = vcombine.low %v2241_v44, %v2242_v11 }
 0x1f1   :  { %v2315_v57 = vpop.permute.xlu1 %2314 }
 0x1f2   :  { %v2226_v51 = vmax.bf16 %v5187_v0, %v2194_v20  ;;  %3251 = vmatprep.subr.bf16.mxu0 %v3236_v38  ;;  %3356 = vmatprep.subr.bf16.mxu1 %v3236_v38  ;;  %v3399_v0 = vld [vmem:[%s5147_s3 + $0x94] ss:$8 sps:$4 sm:$0xff]   ;;  %v4965_v18 = vpop.permute.xlu0 %2339 }
 0x1f4   :  { %v3228_v37 = vcombine.low %v2225_v62, %v2226_v51 }
 0x1f5   :  { %v4963_v23 = vpop.permute.xlu1 %2324 }
 0x1f6   :  { %3252 = vmatpush3.bf16.msra.mxu0 %v3228_v37  ;;  %3364 = vmatpush3.bf16.msra.mxu1 %v3228_v37  ;;  %v4969_v24 = vpop.permute.xlu0 %2349 }
 0x1f9   :  { %2756 = vmatmul.mubr.bf16.vlgmr.msra.gmra.mrb[0].mxu0 %v3391_v63  ;;  %2820 = vmatmul.mubr.bf16.vlgmr.msra.gmra.mrb[0].mxu1 %v3394_v17  ;;  %v4967_v4 = vpop.permute.xlu1 %2334 }
 0x1fa   :  { %2763 = vmatprep.mubr.bf16.mxu0 %v3397_v28  ;;  %2827 = vmatprep.mubr.bf16.mxu1 %v3399_v0  ;;  %v4973_v52 = vpop.permute.xlu0 %2359 }
 0x1fd   :  { %v4971_v42 = vpop.permute.xlu1 %2344 }
 0x1fe   :  { %v4977_v15 = vpop.permute.xlu0 %2369 }
 0x201   :  { %2764 = vmatmul.mubr.bf16.gmra.mrb[4].mxu0 %v3401_v13  ;;  %2828 = vmatmul.mubr.bf16.gmra.mrb[4].mxu1 %v3402_v50  ;;  %v4975_v9 = vpop.permute.xlu1 %2354 }
 0x202   :  { %2771 = vmatprep.mubr.bf16.mxu0 %v3403_v26  ;;  %2835 = vmatprep.mubr.bf16.mxu1 %v3405_v43  ;;  %v4981_v33 = vpop.permute.xlu0 %2379 }
 0x205   :  { %v4979_v12 = vpop.permute.xlu1 %2364 }
 0x206   :  { %v4985_v25 = vpop.permute.xlu0 %2389 }
 0x209   :  { %2772 = vmatmul.mubr.bf16.gmra.mrb[8].mxu0 %v3407_v1  ;;  %2836 = vmatmul.mubr.bf16.gmra.mrb[8].mxu1 %v3408_v27  ;;  %v4983_v16 = vpop.permute.xlu1 %2374 }
 0x20a   :  { %2779 = vmatprep.mubr.bf16.mxu0 %v3409_v5  ;;  %2843 = vmatprep.mubr.bf16.mxu1 %v3411_v39  ;;  %v4989_v22 = vpop.permute.xlu0 %2399 }
 0x20d   :  { %v4987_v21 = vpop.permute.xlu1 %2384 }
 0x20e   :  { %v4993_v40 = vpop.permute.xlu0 %2409 }
 0x211   :  { %2780 = vmatmul.mubr.bf16.gmra.mrb[12].mxu0 %v3413_v58  ;;  %2844 = vmatmul.mubr.bf16.gmra.mrb[12].mxu1 %v3414_v55  ;;  %v4991_v14 = vpop.permute.xlu1 %2394 }
 0x212   :  { %2787 = vmatprep.mubr.bf16.mxu0 %v3415_v2  ;;  %2851 = vmatprep.mubr.bf16.mxu1 %v3417_v60  ;;  %v4997_v56 = vpop.permute.xlu0 %2419 }
 0x215   :  { %v4995_v3 = vpop.permute.xlu1 %2404 }
 0x216   :  { %v5001_v44 = vpop.permute.xlu0 %2429 }
 0x219   :  { %2788 = vmatmul.mubr.bf16.gmra.mrb[16].mxu0 %v3419_v29  ;;  %2852 = vmatmul.mubr.bf16.gmra.mrb[16].mxu1 %v3420_v53  ;;  %v4999_v31 = vpop.permute.xlu1 %2414 }
 0x21a   :  { %2795 = vmatprep.mubr.bf16.mxu0 %v3421_v61  ;;  %2859 = vmatprep.mubr.bf16.mxu1 %v3423_v10  ;;  %v5005_v59 = vpop.permute.xlu0 %2439 }
 0x21d   :  { %v5003_v7 = vpop.permute.xlu1 %2424 }
 0x21e   :  { %v5009_v11 = vpop.permute.xlu0 %2449 }
 0x221   :  { %2796 = vmatmul.mubr.bf16.gmra.mrb[20].mxu0 %v3425_v49  ;;  %2860 = vmatmul.mubr.bf16.gmra.mrb[20].mxu1 %v3426_v19  ;;  %v5007_v41 = vpop.permute.xlu1 %2434 }
 0x222   :  { %2803 = vmatprep.mubr.bf16.mxu0 %v3427_v8  ;;  %2867 = vmatprep.mubr.bf16.mxu1 %v3429_v35  ;;  %v2956_v20 = vpop.permute.xlu0 %2955 }
 0x225   :  { %v5011_v54 = vpop.permute.xlu1 %2444 }
 0x226   :  { %v2966_v62 = vpop.permute.xlu0 %2965 }
 0x229   :  { %2804 = vmatmul.mubr.bf16.gmra.mrb[24].mxu0 %v3431_v30  ;;  %2868 = vmatmul.mubr.bf16.gmra.mrb[24].mxu1 %v3432_v32  ;;  %v2951_v38 = vpop.permute.xlu1 %2950 }
 0x22a   :  { %2811 = vmatprep.mubr.bf16.mxu0 %v3433_v6  ;;  %2875 = vmatprep.mubr.bf16.mxu1 %v3435_v45  ;;  %v5013_v37 = vpop.permute.xlu0 %2975 }
 0x22d   :  { %v2961_v51 = vpop.permute.xlu1 %2960 }
 0x22e   :  { %v5017_v17 = vpop.permute.xlu0 %2985 }
 0x231   :  { %2812 = vmatmul.mubr.bf16.gmra.mrb[28].mxu0 %v3437_v46  ;;  %2876 = vmatmul.mubr.bf16.gmra.mrb[28].mxu1 %v3438_v48  ;;  %v5015_v63 = vpop.permute.xlu1 %2970 }
 0x232   :  { %v5025_v61 = vpop.permute.xlu0 %2995 }
 0x235   :  { %v5019_v28 = vpop.permute.xlu1 %2980 }
 0x239   :  { %v5027_v10 = vpop.permute.xlu1 %2990 }
 0x2cc   :  { %v3253_v0 = vpop.f32.mrb[0].mxu0  ;;  %v3301_v13 = vpop.f32.mrb[0].mxu1 }
 0x2cd   :  { %v3254_v50 = vpop.f32.mrb[1].mxu0  ;;  %v3302_v26 = vpop.f32.mrb[1].mxu1 }
 0x2ce   :  { %v3255_v43 = vadd.f32 %v3254_v50, %v3253_v0  ;;  %v5021_v1 = vadd.f32 %v3302_v26, %v3301_v13  ;;  %v3256_v27 = vpop.f32.mrb[2].mxu0  ;;  %v3304_v5 = vpop.f32.mrb[2].mxu1 }
 0x2cf   :  { %v3257_v39 = vpop.f32.mrb[3].mxu0  ;;  %v3305_v58 = vpop.f32.mrb[3].mxu1 }
 0x2d0   :  { %v2758_v55 = vadd.f32 %v3255_v43, %v2310_v36  ;;  %v3258_v2 = vadd.f32 %v3257_v39, %v3256_v27  ;;  %v5023_v60 = vadd.f32 %v3305_v58, %v3304_v5  ;;  %v5035_v39 = vpop.permute.xlu0 %3005 }
 0x2d2   :  { %v2884_v29 = vmax.f32 %v2758_v55, 0.0  ;;  %v2761_v53 = vadd.f32 %v3258_v2, %v2315_v57 }
 0x2d4   :  { %v2885_v49 = vmax.f32 %v2761_v53, 0.0  ;;  %v3259_v19 = vpop.f32.mrb[4].mxu0  ;;  %v3307_v8 = vpop.f32.mrb[4].mxu1  ;;  %v3108_v32 = vmul.f32 %v2951_v38, %v2884_v29 }
 0x2d5   :  { %v3260_v35 = vpop.f32.mrb[5].mxu0  ;;  %v3308_v30 = vpop.f32.mrb[5].mxu1 }
 0x2d6   :  { %v3109_v6 = vmul.f32 %v2956_v20, %v2885_v49  ;;  %v3261_v45 = vadd.f32 %v3260_v35, %v3259_v19  ;;  %v5029_v46 = vadd.f32 %v3308_v30, %v3307_v8  ;;  %v3262_v48 = vpop.f32.mrb[6].mxu0  ;;  %v3310_v36 = vpop.f32.mrb[6].mxu1 }
 0x2d7   :  { %v3263_v0 = vpop.f32.mrb[7].mxu0  ;;  %v3311_v13 = vpop.f32.mrb[7].mxu1 }
 0x2d8   :  { %v3140_v50 = vadd.f32 %v3109_v6, %v3108_v32  ;;  %v2766_v57 = vadd.f32 %v3261_v45, %v4959_v34  ;;  %v3264_v26 = vadd.f32 %v3263_v0, %v3262_v48  ;;  %v5032_v43 = vadd.f32 %v3311_v13, %v3310_v36  ;;  %v5037_v38 = vpop.permute.xlu1 %3000  ;;  %v5045_v13 = vpop.permute.xlu0 %3015 }
 0x2da   :  { %v2886_v27 = vmax.f32 %v2766_v57, 0.0  ;;  %v2769_v5 = vadd.f32 %v3264_v26, %v4963_v23 }
 0x2dc   :  { %v3110_v20 = vmul.f32 %v2961_v51, %v2886_v27  ;;  %v2887_v58 = vmax.f32 %v2769_v5, 0.0  ;;  %v3265_v55 = vpop.f32.mrb[8].mxu0  ;;  %v3313_v2 = vpop.f32.mrb[8].mxu1 }
 0x2dd   :  { %v3266_v29 = vpop.f32.mrb[9].mxu0  ;;  %v3314_v53 = vpop.f32.mrb[9].mxu1 }
 0x2de   :  { %v3141_v49 = vadd.f32 %v3140_v50, %v3110_v20  ;;  %v3111_v19 = vmul.f32 %v2966_v62, %v2887_v58  ;;  %v3267_v8 = vadd.f32 %v3266_v29, %v3265_v55  ;;  %v5039_v34 = vadd.f32 %v3314_v53, %v3313_v2  ;;  %v3268_v35 = vpop.f32.mrb[10].mxu0  ;;  %v3316_v30 = vpop.f32.mrb[10].mxu1 }
 0x2df   :  { %v3269_v32 = vpop.f32.mrb[11].mxu0  ;;  %v3317_v6 = vpop.f32.mrb[11].mxu1 }
 0x2e0   :  { %v3142_v23 = vadd.f32 %v3141_v49, %v3111_v19  ;;  %v2774_v45 = vadd.f32 %v3267_v8, %v4961_v47  ;;  %v3270_v48 = vadd.f32 %v3269_v32, %v3268_v35  ;;  %v5042_v36 = vadd.f32 %v3317_v6, %v3316_v30  ;;  %v5047_v50 = vpop.permute.xlu1 %3010  ;;  %v5057_v6 = vpop.permute.xlu0 %3025 }
 0x2e2   :  { %v2888_v51 = vmax.f32 %v2774_v45, 0.0  ;;  %v2777_v0 = vadd.f32 %v3270_v48, %v4967_v4 }
 0x2e4   :  { %v3112_v62 = vmul.f32 %v5015_v63, %v2888_v51  ;;  %v2889_v57 = vmax.f32 %v2777_v0, 0.0  ;;  %v3271_v26 = vpop.f32.mrb[12].mxu0  ;;  %v3319_v27 = vpop.f32.mrb[12].mxu1 }
 0x2e5   :  { %v3272_v5 = vpop.f32.mrb[13].mxu0  ;;  %v3320_v20 = vpop.f32.mrb[13].mxu1 }
 0x2e6   :  { %v3143_v58 = vadd.f32 %v3142_v23, %v3112_v62  ;;  %v3113_v47 = vmul.f32 %v5013_v37, %v2889_v57  ;;  %v3273_v55 = vadd.f32 %v3272_v5, %v3271_v26  ;;  %v5051_v2 = vadd.f32 %v3320_v20, %v3319_v27  ;;  %v3274_v29 = vpop.f32.mrb[14].mxu0  ;;  %v3322_v53 = vpop.f32.mrb[14].mxu1 }
 0x2e7   :  { %v3275_v4 = vpop.f32.mrb[15].mxu0  ;;  %v3323_v49 = vpop.f32.mrb[15].mxu1 }
 0x2e8   :  { %v3144_v19 = vadd.f32 %v3143_v58, %v3113_v47  ;;  %v2782_v8 = vadd.f32 %v3273_v55, %v4965_v18  ;;  %v3276_v35 = vadd.f32 %v3275_v4, %v3274_v29  ;;  %v5054_v63 = vadd.f32 %v3323_v49, %v3322_v53  ;;  %v5059_v23 = vpop.permute.xlu1 %3020  ;;  %v5069_v49 = vpop.permute.xlu0 %3035 }
 0x2ea   :  { %v2890_v30 = vmax.f32 %v2782_v8, 0.0  ;;  %v2785_v32 = vadd.f32 %v3276_v35, %v4971_v42 }
 0x2ec   :  { %v3114_v37 = vmul.f32 %v5019_v28, %v2890_v30  ;;  %v2891_v45 = vmax.f32 %v2785_v32, 0.0  ;;  %v3277_v48 = vpop.f32.mrb[16].mxu0  ;;  %v3325_v51 = vpop.f32.mrb[16].mxu1 }
 0x2ed   :  { %v3278_v0 = vpop.f32.mrb[17].mxu0  ;;  %v3326_v62 = vpop.f32.mrb[17].mxu1 }
 0x2ee   :  { %v3145_v57 = vadd.f32 %v3144_v19, %v3114_v37  ;;  %v3115_v18 = vmul.f32 %v5017_v17, %v2891_v45  ;;  %v3279_v26 = vadd.f32 %v3278_v0, %v3277_v48  ;;  %v5063_v27 = vadd.f32 %v3326_v62, %v3325_v51  ;;  %v3280_v5 = vpop.f32.mrb[18].mxu0  ;;  %v3328_v20 = vpop.f32.mrb[18].mxu1 }
 0x2ef   :  { %v3281_v42 = vpop.f32.mrb[19].mxu0  ;;  %v3329_v58 = vpop.f32.mrb[19].mxu1 }
 0x2f0   :  { %v3146_v47 = vadd.f32 %v3145_v57, %v3115_v18  ;;  %v2790_v55 = vadd.f32 %v3279_v26, %v4969_v24  ;;  %v3282_v29 = vadd.f32 %v3281_v42, %v3280_v5  ;;  %v5066_v28 = vadd.f32 %v3329_v58, %v3328_v20  ;;  %v5071_v19 = vpop.permute.xlu1 %3030  ;;  %v5081_v58 = vpop.permute.xlu0 %3045 }
 0x2f2   :  { %v2892_v53 = vmax.f32 %v2790_v55, 0.0  ;;  %v2793_v4 = vadd.f32 %v3282_v29, %v4975_v9 }
 0x2f4   :  { %v3116_v17 = vmul.f32 %v5027_v10, %v2892_v53  ;;  %v2893_v8 = vmax.f32 %v2793_v4, 0.0  ;;  %v3283_v35 = vpop.f32.mrb[20].mxu0  ;;  %v3331_v30 = vpop.f32.mrb[20].mxu1 }
 0x2f5   :  { %v3284_v32 = vpop.f32.mrb[21].mxu0  ;;  %v3332_v37 = vpop.f32.mrb[21].mxu1 }
 0x2f6   :  { %v3147_v45 = vadd.f32 %v3146_v47, %v3116_v17  ;;  %v3117_v24 = vmul.f32 %v5025_v61, %v2893_v8  ;;  %v3285_v48 = vadd.f32 %v3284_v32, %v3283_v35  ;;  %v5075_v51 = vadd.f32 %v3332_v37, %v3331_v30  ;;  %v3286_v0 = vpop.f32.mrb[22].mxu0  ;;  %v3334_v62 = vpop.f32.mrb[22].mxu1 }
 0x2f7   :  { %v3287_v9 = vpop.f32.mrb[23].mxu0  ;;  %v3335_v57 = vpop.f32.mrb[23].mxu1 }
 0x2f8   :  { %v3148_v18 = vadd.f32 %v3147_v45, %v3117_v24  ;;  %v2798_v26 = vadd.f32 %v3285_v48, %v4973_v52  ;;  %v3288_v5 = vadd.f32 %v3287_v9, %v3286_v0  ;;  %v5078_v10 = vadd.f32 %v3335_v57, %v3334_v62  ;;  %v5083_v47 = vpop.permute.xlu1 %3040  ;;  %v3056_v57 = vpop.permute.xlu0 %3055 }
 0x2fa   :  { %v2894_v20 = vmax.f32 %v2798_v26, 0.0  ;;  %v2801_v42 = vadd.f32 %v3288_v5, %v4979_v12 }
 0x2fc   :  { %v3118_v61 = vmul.f32 %v5037_v38, %v2894_v20  ;;  %v2895_v55 = vmax.f32 %v2801_v42, 0.0  ;;  %v3289_v29 = vpop.f32.mrb[24].mxu0  ;;  %v3337_v53 = vpop.f32.mrb[24].mxu1 }
 0x2fd   :  { %v3290_v4 = vpop.f32.mrb[25].mxu0  ;;  %v3338_v17 = vpop.f32.mrb[25].mxu1 }
 0x2fe   :  { %v3149_v8 = vadd.f32 %v3148_v18, %v3118_v61  ;;  %v3119_v52 = vmul.f32 %v5035_v39, %v2895_v55  ;;  %v3291_v35 = vadd.f32 %v3290_v4, %v3289_v29  ;;  %v5087_v30 = vadd.f32 %v3338_v17, %v3337_v53  ;;  %v3292_v32 = vpop.f32.mrb[26].mxu0  ;;  %v3340_v37 = vpop.f32.mrb[26].mxu1 }
 0x2ff   :  { %v3293_v12 = vpop.f32.mrb[27].mxu0  ;;  %v3341_v45 = vpop.f32.mrb[27].mxu1 }
 0x300   :  { %v3150_v24 = vadd.f32 %v3149_v8, %v3119_v52  ;;  %v2806_v48 = vadd.f32 %v3291_v35, %v4977_v15  ;;  %v3294_v0 = vadd.f32 %v3293_v12, %v3292_v32  ;;  %v5090_v38 = vadd.f32 %v3341_v45, %v3340_v37  ;;  %v3051_v18 = vpop.permute.xlu1 %3050 }
 0x302   :  { %v2896_v62 = vmax.f32 %v2806_v48, 0.0  ;;  %v2809_v9 = vadd.f32 %v3294_v0, %v4983_v16  ;;  %v2822_v16 = vadd.f32 %v5021_v1, %v4985_v25  ;;  %v2830_v0 = vadd.f32 %v5029_v46, %v4989_v22  ;;  %v3066_v1 = vpop.permute.xlu0 %3065 }
 0x304   :  { %v3120_v39 = vmul.f32 %v5047_v50, %v2896_v62  ;;  %v2897_v26 = vmax.f32 %v2809_v9, 0.0  ;;  %v3295_v5 = vpop.f32.mrb[28].mxu0  ;;  %v3343_v20 = vpop.f32.mrb[28].mxu1  ;;  %v2900_v48 = vmax.f32 %v2822_v16, 0.0 }
 0x305   :  { %v3296_v42 = vpop.f32.mrb[29].mxu0  ;;  %v3344_v61 = vpop.f32.mrb[29].mxu1 }
 0x306   :  { %v3151_v55 = vadd.f32 %v3150_v24, %v3120_v39  ;;  %v3121_v29 = vmul.f32 %v5045_v13, %v2897_v26  ;;  %v3297_v53 = vadd.f32 %v3296_v42, %v3295_v5  ;;  %v5095_v15 = vadd.f32 %v3344_v61, %v3343_v20  ;;  %v3298_v4 = vpop.f32.mrb[30].mxu0  ;;  %v3346_v17 = vpop.f32.mrb[30].mxu1 }
 0x307   :  { %v3299_v8 = vpop.f32.mrb[31].mxu0  ;;  %v3347_v52 = vpop.f32.mrb[31].mxu1  ;;  %v2825_v13 = vadd.f32 %v5023_v60, %v4991_v14  ;;  %v3124_v14 = vmul.f32 %v5071_v19, %v2900_v48  ;;  %v2902_v60 = vmax.f32 %v2830_v0, 0.0 }
 0x308   :  { %v3152_v35 = vadd.f32 %v3151_v55, %v3121_v29  ;;  %v2814_v50 = vadd.f32 %v3297_v53, %v4981_v33  ;;  %v3300_v32 = vadd.f32 %v3299_v8, %v3298_v4  ;;  %v3061_v37 = vpop.permute.xlu1 %3060  ;;  %v5100_v12 = vadd.f32 %v3347_v52, %v3346_v17  ;;  %v3076_v61 = vpop.permute.xlu0 %3075 }
 0x309   :  { %v2901_v9 = vmax.f32 %v2825_v13, 0.0  ;;  %v2833_v33 = vadd.f32 %v5032_v43, %v4995_v3  ;;  %v3126_v3 = vmul.f32 %v5083_v47, %v2902_v60 }
 0x30a   :  { %v2898_v45 = vmax.f32 %v2814_v50, 0.0  ;;  %v2817_v24 = vadd.f32 %v3300_v32, %v4987_v21  ;;  %v2838_v21 = vadd.f32 %v5039_v34, %v4993_v40  ;;  %v2849_v34 = vadd.f32 %v5054_v63, %v5003_v7 }
 0x30b   :  { %v3125_v22 = vmul.f32 %v5069_v49, %v2901_v9  ;;  %v2903_v46 = vmax.f32 %v2833_v33, 0.0  ;;  %v2862_v7 = vadd.f32 %v5075_v51, %v5005_v59 }
 0x30c   :  { %v3122_v62 = vmul.f32 %v5059_v23, %v2898_v45  ;;  %v2899_v25 = vmax.f32 %v2817_v24, 0.0  ;;  %v3071_v5 = vpop.permute.xlu1 %3070  ;;  %v2841_v23 = vadd.f32 %v5042_v36, %v4999_v31  ;;  %v2904_v43 = vmax.f32 %v2838_v21, 0.0  ;;  %v2455_v47 = vpop.permute.xlu0 %2454 }
 0x30d   :  { %v3127_v29 = vmul.f32 %v5081_v58, %v2903_v46  ;;  %v2854_v31 = vadd.f32 %v5063_v27, %v5001_v44  ;;  %v2907_v8 = vmax.f32 %v2849_v34, 0.0  ;;  %v2865_v44 = vadd.f32 %v5078_v10, %v5011_v54 }
 0x30e   :  { %v3153_v39 = vadd.f32 %v3152_v35, %v3122_v62  ;;  %v3123_v26 = vmul.f32 %v5057_v6, %v2899_v25  ;;  %v2846_v6 = vadd.f32 %v5051_v2, %v4997_v56  ;;  %v2905_v40 = vmax.f32 %v2841_v23, 0.0 }
 0x30f   :  { %v3128_v53 = vmul.f32 %v3051_v18, %v2904_v43  ;;  %v2857_v56 = vadd.f32 %v5066_v28, %v5007_v41  ;;  %v2908_v16 = vmax.f32 %v2854_v31, 0.0  ;;  %v3131_v18 = vmul.f32 %v3066_v1, %v2907_v8 }
 0x310   :  { %v3154_v20 = vadd.f32 %v3153_v39, %v3123_v26  ;;  %v3081_v55 = vpop.permute.xlu1 %3080  ;;  %v2906_v4 = vmax.f32 %v2846_v6, 0.0  ;;  %v3129_v17 = vmul.f32 %v3056_v57, %v2905_v40  ;;  %v2460_v50 = vpop.permute.xlu0 %2459  ;;  %v2910_v32 = vmax.f32 %v2862_v7, 0.0 }
 0x311   :  { %v2909_v35 = vmax.f32 %v2857_v56, 0.0  ;;  %v3132_v57 = vmul.f32 %v3071_v5, %v2908_v16  ;;  %v2870_v41 = vadd.f32 %v5087_v30, %v5009_v11  ;;  %v2911_v45 = vmax.f32 %v2865_v44, 0.0 }
 0x312   :  { %v3155_v42 = vadd.f32 %v3154_v20, %v3124_v14  ;;  %v3130_v58 = vmul.f32 %v3061_v37, %v2906_v4  ;;  %v2873_v24 = vadd.f32 %v5090_v38, %v2455_v47  ;;  %v3134_v51 = vmul.f32 %v3081_v55, %v2910_v32 }
 0x313   :  { %v3133_v37 = vmul.f32 %v3076_v61, %v2909_v35  ;;  %v2912_v48 = vmax.f32 %v2870_v41, 0.0  ;;  %v2878_v0 = vadd.f32 %v5095_v15, %v2460_v50  ;;  %v3178_v43 = vstv %s5148_s6 }
 0x314   :  { %v3156_v19 = vadd.f32 %v3155_v42, %v3125_v22  ;;  %v3086_v52 = vpop.permute.xlu1 %3085  ;;  %v2465_v54 = vpop.permute.xlu0 %2464  ;;  %v2913_v25 = vmax.f32 %v2873_v24, 0.0 }
 0x315   :  { %v3135_v10 = vmul.f32 %v3086_v52, %v2911_v45  ;;  %v2881_v1 = vadd.f32 %v5100_v12, %v2465_v54  ;;  %v2914_v30 = vmax.f32 %v2878_v0, 0.0 }
 0x316   :  { %v3157_v49 = vadd.f32 %v3156_v19, %v3126_v3 }
 0x317   :  { %v2915_v5 = vmax.f32 %v2881_v1, 0.0 }
 0x318   :  { %v3158_v36 = vadd.f32 %v3157_v49, %v3127_v29  ;;  %v3091_v13 = vpop.permute.xlu1 %3090  ;;  %v3101_v38 = vpop.permute.xlu0 %3100 }
 0x319   :  { %v3136_v11 = vmul.f32 %v3091_v13, %v2912_v48  ;;  %v3138_v60 = vmul.f32 %v3101_v38, %v2914_v30 }
 0x31a   :  { %v3159_v2 = vadd.f32 %v3158_v36, %v3128_v53 }
 0x31c   :  { %v3160_v63 = vadd.f32 %v3159_v2, %v3129_v17  ;;  %v3096_v33 = vpop.permute.xlu1 %3095 }
 0x31d   :  { %v3137_v26 = vmul.f32 %v3096_v33, %v2913_v25 }
 0x31e   :  { %v3161_v27 = vadd.f32 %v3160_v63, %v3130_v58 }
 0x320   :  { %v3162_v28 = vadd.f32 %v3161_v27, %v3131_v18  ;;  %v3106_v20 = vpop.permute.xlu1 %3105 }
 0x321   :  { %v3139_v22 = vmul.f32 %v3106_v20, %v2915_v5 }
 0x322   :  { %v3163_v59 = vadd.f32 %v3162_v28, %v3132_v57 }
 0x324   :  { %v3164_v62 = vadd.f32 %v3163_v59, %v3133_v37 }
 0x326   :  { %v3165_v9 = vadd.f32 %v3164_v62, %v3134_v51 }
 0x328   :  { %v3166_v39 = vadd.f32 %v3165_v9, %v3135_v10 }
 0x32a   :  { %v3167_v14 = vadd.f32 %v3166_v39, %v3136_v11 }
 0x32c   :  { %v3168_v21 = vadd.f32 %v3167_v14, %v3137_v26 }
 0x32e   :  { %v3169_v15 = vadd.f32 %v3168_v21, %v3138_v60 }
 0x330   :  { %v3170_v46 = vadd.f32 %v3169_v15, %v3139_v22 }
 0x332   :  { %v3171_v23 = vrot.slane %v3170_v46, 4 }
 0x334   :  { %v3172_v42 = vadd.f32 %v3171_v23, %v3170_v46 }
 0x336   :  { %v3173_v61 = vrot.slane %v3172_v42, 2 }
 0x338   :  { %v3174_v3 = vadd.f32 %v3173_v61, %v3172_v42 }
 0x33a   :  { %v3175_v12 = vrot.slane %v3174_v3, 1 }
 0x33c   :  { %v3176_v6 = vadd.f32 %v3175_v12, %v3174_v3 }
 0x33e   :  { %v3179_v19 = vadd.f32 %v3178_v43, %v3176_v6 }
 0x340   :  { %3180 = vst [vmem:[%s5149_s7] sm:$0x1] %v3179_v19 }

</bundles_post_ra>
